<compile_context>
chip_gen: v7x
topology: tpu7x:2x2x1
jax: 0.10.0
libtpu: 0.0.40
codegen_flags: <defaults>
</compile_context>

<pallas_src>
import functools

import jax
import jax.numpy as jnp
from jax import lax
from jax.experimental import pallas as pl
from jax.experimental.pallas import tpu as pltpu

LANE = 128
SUB = 16          # bf16 sublane tile


def _round_up(x, m):
    return (x + m - 1) // m * m


# --------------------------- Pallas kernel: conv matmul ----------------------
def _matmul_bias_act_kernel(x_ref, w_ref, b_ref, o_ref, *, relu):
    """One M-tile of y = act(x @ w + b).  x:[TM,K] bf16, w:[K,N] bf16, b:[1,N] f32."""
    y = jnp.dot(x_ref[...], w_ref[...], preferred_element_type=jnp.float32)
    y = y + b_ref[...]
    if relu:
        y = jnp.maximum(y, 0.0)
    o_ref[...] = y.astype(o_ref.dtype)


def pallas_matmul_bias(x, w, b, *, relu, out_dtype, tm=512):
    """act(x @ w + b) tiled over M with a parallel (megacore-shardable) grid."""
    M, K = x.shape
    N = w.shape[1]
    TM = min(tm, _round_up(max(M, 1), SUB))       # bf16-sublane-aligned tile
    M_pad = _round_up(M, TM)
    if M_pad != M:
        # Ragged last tile only; XLA fuses the pad into the fusion that already
        # materializes the patch tensor (no separate HBM pass).
        x = jnp.pad(x, ((0, M_pad - M), (0, 0)))
    out = pl.pallas_call(
        functools.partial(_matmul_bias_act_kernel, relu=relu),
        out_shape=jax.ShapeDtypeStruct((M_pad, N), out_dtype),
        grid=(M_pad // TM,),
        in_specs=[
            pl.BlockSpec((TM, K), lambda i: (i, 0)),
            pl.BlockSpec((K, N), lambda i: (0, 0)),
            pl.BlockSpec((1, N), lambda i: (0, 0)),
        ],
        out_specs=pl.BlockSpec((TM, N), lambda i: (i, 0)),
        compiler_params=pltpu.CompilerParams(
            dimension_semantics=("parallel",),
            vmem_limit_bytes=32 * 1024 * 1024),
    )(x, w, b)
    return out[:M] if M_pad != M else out


# -------------------- Pallas kernel: fused conv3 -> fc tail -------------------
def _actor_tail_kernel(p3_ref, w3_ref, b3_ref, w1_ref, b1_ref, w2_ref, b2_ref,
                       o_ref, acc_ref):
    """Fused conv3 -> ReLU -> Flatten -> fc1 -> ReLU -> fc_logits, one batch tile.

    p3_ref: [S3, TB, K3] bf16 conv3 im2col patches (one slab per output pixel).
    w1_ref: [S3, 64, 512] bf16 fc1 weight, permuted once at init from PyTorch's
            NCHW-flatten column order so that
                Flatten(relu(conv3)) @ W1^T == sum_s relu(conv3[s]) @ W1p[s].
    The sum over spatial positions runs as a fori_loop accumulating into a VMEM
    scratch ref; the 512-wide hidden and conv3 activations never touch HBM.
    """
    s3 = p3_ref.shape[0]
    acc_ref[...] = jnp.zeros_like(acc_ref)

    def body(s, carry):
        h3 = jnp.dot(p3_ref[s], w3_ref[...], preferred_element_type=jnp.float32)
        h3 = jnp.maximum(h3 + b3_ref[...], 0.0).astype(jnp.bfloat16)
        acc_ref[...] += jnp.dot(h3, w1_ref[s], preferred_element_type=jnp.float32)
        return carry

    lax.fori_loop(0, s3, body, 0)

    h1 = jnp.maximum(acc_ref[...] + b1_ref[...], 0.0).astype(jnp.bfloat16)
    o_ref[...] = (jnp.dot(h1, w2_ref[...], preferred_element_type=jnp.float32)
                  + b2_ref[...])


def pallas_actor_tail(p3, w3, b3, w1, b1, w2, b2, *, tb):
    S3, Bp, K3 = p3.shape
    C3 = w3.shape[1]
    HID = w1.shape[2]
    N = w2.shape[1]
    return pl.pallas_call(
        _actor_tail_kernel,
        out_shape=jax.ShapeDtypeStruct((Bp, N), jnp.float32),
        grid=(Bp // tb,),
        in_specs=[
            pl.BlockSpec((S3, tb, K3), lambda i: (0, i, 0)),   # batch-tiled patches
            pl.BlockSpec((K3, C3), lambda i: (0, 0)),
            pl.BlockSpec((1, C3), lambda i: (0, 0)),
            pl.BlockSpec((S3, C3, HID), lambda i: (0, 0, 0)),
            pl.BlockSpec((1, HID), lambda i: (0, 0)),
            pl.BlockSpec((HID, N), lambda i: (0, 0)),
            pl.BlockSpec((1, N), lambda i: (0, 0)),
        ],
        out_specs=pl.BlockSpec((tb, N), lambda i: (i, 0)),
        scratch_shapes=[pltpu.VMEM((tb, HID), jnp.float32)],
        compiler_params=pltpu.CompilerParams(
            dimension_semantics=("parallel",),
            vmem_limit_bytes=48 * 1024 * 1024),
    )(p3, w3, b3, w1, b1, w2, b2)


# ------------------------------ conv as im2col -------------------------------
# TODO(synk): patch extraction is still thin host-side JAX feeding the Pallas
# matmuls (one extra HBM pass over the kh*kw/stride^2-expanded patch tensor).
# Pulling it in-kernel needs lane/sublane re-layout of overlapping spatial
# windows inside Mosaic (strided value slices + dim merges); deferred for
# lowering robustness across v5e/v6e/v7x.
def im2col_nhwc(x, kh, kw, stride):
    """NHWC x -> patches [B, OH*OW, kh*kw*C] (channels fastest), no transposes."""
    B, H, W, C = x.shape
    oh = (H - kh) // stride + 1
    ow = (W - kw) // stride + 1
    cols = jnp.stack(
        [x[:, i:i + stride * oh:stride, j:j + stride * ow:stride, :]
         for i in range(kh) for j in range(kw)],
        axis=3,
    )  # [B, oh, ow, kh*kw, C]
    return cols.reshape(B, oh * ow, kh * kw * C), oh, ow


def conv2d_nhwc(x, w_mat, b, kh, kw, stride, *, relu):
    """x: NHWC bf16.  w_mat: [kh*kw*C, N] bf16 (valid channels only), b: [1, N] f32."""
    B = x.shape[0]
    patches, oh, ow = im2col_nhwc(x, kh, kw, stride)
    M = B * oh * ow
    y = pallas_matmul_bias(patches.reshape(M, -1), w_mat, b,
                           relu=relu, out_dtype=jnp.bfloat16)
    return y.reshape(B, oh, ow, -1)


# --------------------------- parameter construction --------------------------
def _kaiming_normal(key, shape, fan_in):
    # nn.init.kaiming_normal_ (fan_in, a=0): std = sqrt(2 / fan_in)
    std = jnp.sqrt(2.0 / fan_in)
    return std * jax.random.normal(key, shape, dtype=jnp.float32)


def _prep_conv(w_torch, bias):
    """Torch [O,C,kh,kw] -> bf16 [kh*kw*C, O] (NHWC patch order) + f32 [1,O] bias.

    No lane padding: intermediate activations are stored valid-width, cutting
    the memory-bound conv store/read traffic (the Pallas block uses the full dim).
    """
    o, c, kh, kw = w_torch.shape
    w = jnp.transpose(w_torch, (2, 3, 1, 0)).reshape(kh * kw * c, o)
    return w.astype(jnp.bfloat16), bias.astype(jnp.float32).reshape(1, o)


def init_actor_params(key, in_ch, n_actions, conv3_hw):
    """conv3_hw = (OH3, OW3): conv3 output spatial size (mirrors the torch zeros probe)."""
    assert n_actions <= LANE, "fc_logits lane padding assumes n_actions <= 128"
    oh3, ow3 = conv3_hw
    s3 = oh3 * ow3
    output_dim = 64 * s3
    keys = jax.random.split(key, 5)
    p = {}
    p["conv1_w"], p["conv1_b"] = _prep_conv(
        _kaiming_normal(keys[0], (32, in_ch, 8, 8), in_ch * 8 * 8),
        jnp.zeros((32,), jnp.float32))
    p["conv2_w"], p["conv2_b"] = _prep_conv(
        _kaiming_normal(keys[1], (64, 32, 4, 4), 32 * 4 * 4),
        jnp.zeros((64,), jnp.float32))
    p["conv3_w"], p["conv3_b"] = _prep_conv(
        _kaiming_normal(keys[2], (64, 64, 3, 3), 64 * 3 * 3),
        jnp.zeros((64,), jnp.float32))
    # fc1: torch weight [512, output_dim] has columns in NCHW-flatten (c,h,w)
    # order; permute once to the NHWC-flatten (h,w,c) order -> [S3, 64, 512].
    fc1_t = _kaiming_normal(keys[3], (512, output_dim), output_dim)
    fc1 = fc1_t.reshape(512, 64, oh3, ow3).transpose(2, 3, 1, 0).reshape(s3, 64, 512)
    p["fc1_w"] = fc1.astype(jnp.bfloat16)
    p["fc1_b"] = jnp.zeros((1, 512), jnp.float32)
    # fc_logits: [n_actions, 512] -> [512, 128] lane-padded (final output only), bf16.
    fcl_t = _kaiming_normal(keys[4], (n_actions, 512), 512)
    p["fc_logits_w"] = jnp.pad(fcl_t.T, ((0, 0), (0, LANE - n_actions))).astype(jnp.bfloat16)
    p["fc_logits_b"] = jnp.zeros((1, LANE), jnp.float32)
    return p


# ------------------------------- Actor forward -------------------------------
def actor_forward(params, x, n_actions):
    """x: [B, C, H, W] float32 (PyTorch NCHW).  Returns logits [B, n_actions] f32.

    Matches Actor.forward exactly (no /255 — that normalization is in get_action).
    """
    B = x.shape[0]
    # Single layout change at the boundary; activations stay NHWC/bf16 after this.
    h = jnp.transpose(x, (0, 2, 3, 1)).astype(jnp.bfloat16)
    h = conv2d_nhwc(h, params["conv1_w"], params["conv1_b"], 8, 8, 4, relu=True)
    h = conv2d_nhwc(h, params["conv2_w"], params["conv2_b"], 4, 4, 2, relu=True)

    # Fused conv3 + Flatten + ReLU + fc1 + ReLU + fc_logits, batch-tiled.
    p3, _, _ = im2col_nhwc(h, 3, 3, 1)                  # [B, S3, 3*3*64]
    TB = 128 if B >= 128 else _round_up(B, SUB)         # v7x-VMEM-safe batch tile
    Bp = _round_up(B, TB)
    # [S3, Bp, K3]; the transpose + pad fuse into the XLA fusion that already
    # materializes the patch tensor (no extra standalone HBM pass).
    p3 = jnp.transpose(p3, (1, 0, 2))
    if Bp != B:
        p3 = jnp.pad(p3, ((0, 0), (0, Bp - B), (0, 0)))
    logits = pallas_actor_tail(
        p3, params["conv3_w"], params["conv3_b"],
        params["fc1_w"], params["fc1_b"],
        params["fc_logits_w"], params["fc_logits_b"], tb=TB)
    return logits[:B, :n_actions]


# ------------------------- plain-JAX reference (check) -----------------------
def reference_forward(params, x, n_actions):
    """f32 plain-JAX reference of the same Actor math, for an in-script check."""
    h = jnp.transpose(x, (0, 2, 3, 1))

    def conv(h, w_mat, b, kh, kw, s):
        p, oh, ow = im2col_nhwc(h, kh, kw, s)
        y = p.reshape(-1, p.shape[-1]) @ w_mat.astype(jnp.float32) + b
        return jnp.maximum(y, 0.0).reshape(h.shape[0], oh, ow, -1)

    h = conv(h, params["conv1_w"], params["conv1_b"], 8, 8, 4)
    h = conv(h, params["conv2_w"], params["conv2_b"], 4, 4, 2)
    p3, _, _ = im2col_nhwc(h, 3, 3, 1)                       # [B, S3, 576]
    h3 = jnp.maximum(
        jnp.einsum("bsk,kc->bsc", p3, params["conv3_w"].astype(jnp.float32))
        + params["conv3_b"], 0.0)
    h1 = jnp.maximum(
        jnp.einsum("bsc,sch->bh", h3, params["fc1_w"].astype(jnp.float32))
        + params["fc1_b"], 0.0)
    logits = h1 @ params["fc_logits_w"].astype(jnp.float32) + params["fc_logits_b"]
    return logits[:, :n_actions]


if __name__ == "__main__":
    key = jax.random.PRNGKey(0)
    # Small Atari-like obs: 4 stacked frames, 44x44 spatial (smallest sizes that
    # give the 8/4 -> 4/2 -> 3/1 conv stack a 2x2 conv3 output, so the tail's
    # spatial fori_loop runs >1 iteration).
    B, C, H, W = 2, 4, 44, 44
    n_actions = 6

    oh1, ow1 = (H - 8) // 4 + 1, (W - 8) // 4 + 1
    oh2, ow2 = (oh1 - 4) // 2 + 1, (ow1 - 4) // 2 + 1
    oh3, ow3 = oh2 - 3 + 1, ow2 - 3 + 1   # mirrors the torch.zeros(1,*obs) probe

    k_x, k_p = jax.random.split(key)
    x = jax.random.uniform(k_x, (B, C, H, W), dtype=jnp.float32)
    params = init_actor_params(k_p, C, n_actions, (oh3, ow3))

    fwd = jax.jit(functools.partial(actor_forward, n_actions=n_actions))
    logits = jax.block_until_ready(fwd(params, x))
    assert logits.shape == (B, n_actions), logits.shape
    assert logits.dtype == jnp.float32

    # Cross-check the Pallas path against a plain-JAX f32 reference of the same
    # math (bf16 MXU operands => loose tolerance).
    ref = reference_forward(params, x, n_actions)
    max_err = float(jnp.max(jnp.abs(logits - ref)))
    tol = 0.1 * float(jnp.max(jnp.abs(ref))) + 0.1
    assert max_err < tol, (max_err, tol)

    print("KERNEL_OK")
</pallas_src>

<mosaic_0001>
module attributes {stable_mosaic.version = 11 : i64} {
  func.func @_matmul_bias_act_kernel(%arg0: i32, %arg1: memref<208x256xbf16, #tpu.memory_space<vmem>>, %arg2: memref<256x32xbf16, #tpu.memory_space<vmem>>, %arg3: memref<1x32xf32, #tpu.memory_space<vmem>>, %arg4: memref<208x32xbf16, #tpu.memory_space<vmem>>) attributes {dimension_semantics = [#tpu.dimension_semantics<parallel>], iteration_bounds = array<i64: 1>, scalar_prefetch = 0 : i64, scratch_operands = 0 : i64, tpu.core_type = #tpu.core_type<tc>, window_params = [{transform_indices = @transform_0, window_bounds = array<i64: 208, 256>}, {pipeline_mode = #tpu.pipeline_mode<synchronous>, transform_indices = @transform_1, window_bounds = array<i64: 256, 32>}, {pipeline_mode = #tpu.pipeline_mode<synchronous>, transform_indices = @transform_2, window_bounds = array<i64: 1, 32>}, {transform_indices = @transform_3, window_bounds = array<i64: 208, 32>}]} {
    %c0 = arith.constant 0 : index
    %c0_0 = arith.constant 0 : index
    %0 = vector.load %arg1[%c0, %c0_0] : memref<208x256xbf16, #tpu.memory_space<vmem>>, vector<208x256xbf16>
    %c0_1 = arith.constant 0 : index
    %c0_2 = arith.constant 0 : index
    %1 = vector.load %arg2[%c0_1, %c0_2] : memref<256x32xbf16, #tpu.memory_space<vmem>>, vector<256x32xbf16>
    %cst = arith.constant dense<0.000000e+00> : vector<208x32xf32>
    %2 = tpu.matmul %0, %1, %cst {dimension_numbers = #tpu.dot_dimension_numbers<[1], [0], [0], [1], [0, 0, 1, 1], [], []>} : vector<208x256xbf16>, vector<256x32xbf16>, vector<208x32xf32> -> vector<208x32xf32>
    %c0_3 = arith.constant 0 : index
    %c0_4 = arith.constant 0 : index
    %3 = vector.load %arg3[%c0_3, %c0_4] : memref<1x32xf32, #tpu.memory_space<vmem>>, vector<1x32xf32>
    %4 = vector.broadcast %3 : vector<1x32xf32> to vector<208x32xf32>
    %5 = arith.addf %2, %4 : vector<208x32xf32>
    %cst_5 = arith.constant 0.000000e+00 : f32
    %6 = vector.broadcast %cst_5 : f32 to vector<208x32xf32>
    %7 = arith.maximumf %5, %6 : vector<208x32xf32>
    %8 = arith.truncf %7 : vector<208x32xf32> to vector<208x32xbf16>
    %c0_6 = arith.constant 0 : index
    %c0_7 = arith.constant 0 : index
    %9 = vector.load %arg4[%c0_6, %c0_7] : memref<208x32xbf16, #tpu.memory_space<vmem>>, vector<208x32xbf16>
    tpu.vector_store %arg4[%c0_6, %c0_7], %8 {strides = array<i32>} : memref<208x32xbf16, #tpu.memory_space<vmem>>, vector<208x32xbf16>,
    return
  }
  func.func @transform_0(%arg0: i32) -> (i32, i32) {
    %c0_i32 = arith.constant 0 : i32
    %c0_i32_0 = arith.constant 0 : i32
    return %arg0, %c0_i32 : i32, i32
  }
  func.func @transform_1(%arg0: i32) -> (i32, i32) {
    %c0_i32 = arith.constant 0 : i32
    %c0_i32_0 = arith.constant 0 : i32
    %c0_i32_1 = arith.constant 0 : i32
    return %c0_i32, %c0_i32_0 : i32, i32
  }
  func.func @transform_2(%arg0: i32) -> (i32, i32) {
    %c0_i32 = arith.constant 0 : i32
    %c0_i32_0 = arith.constant 0 : i32
    %c0_i32_1 = arith.constant 0 : i32
    return %c0_i32, %c0_i32_0 : i32, i32
  }
  func.func @transform_3(%arg0: i32) -> (i32, i32) {
    %c0_i32 = arith.constant 0 : i32
    %c0_i32_0 = arith.constant 0 : i32
    return %arg0, %c0_i32 : i32, i32
  }
}

module attributes {stable_mosaic.version = 11 : i64} {
  func.func @_matmul_bias_act_kernel(%arg0: i32, %arg1: memref<32x512xbf16, #tpu.memory_space<vmem>>, %arg2: memref<512x64xbf16, #tpu.memory_space<vmem>>, %arg3: memref<1x64xf32, #tpu.memory_space<vmem>>, %arg4: memref<32x64xbf16, #tpu.memory_space<vmem>>) attributes {dimension_semantics = [#tpu.dimension_semantics<parallel>], iteration_bounds = array<i64: 1>, scalar_prefetch = 0 : i64, scratch_operands = 0 : i64, tpu.core_type = #tpu.core_type<tc>, window_params = [{transform_indices = @transform_0, window_bounds = array<i64: 32, 512>}, {pipeline_mode = #tpu.pipeline_mode<synchronous>, transform_indices = @transform_1, window_bounds = array<i64: 512, 64>}, {pipeline_mode = #tpu.pipeline_mode<synchronous>, transform_indices = @transform_2, window_bounds = array<i64: 1, 64>}, {transform_indices = @transform_3, window_bounds = array<i64: 32, 64>}]} {
    %c0 = arith.constant 0 : index
    %c0_0 = arith.constant 0 : index
    %0 = vector.load %arg1[%c0, %c0_0] : memref<32x512xbf16, #tpu.memory_space<vmem>>, vector<32x512xbf16>
    %c0_1 = arith.constant 0 : index
    %c0_2 = arith.constant 0 : index
    %1 = vector.load %arg2[%c0_1, %c0_2] : memref<512x64xbf16, #tpu.memory_space<vmem>>, vector<512x64xbf16>
    %cst = arith.constant dense<0.000000e+00> : vector<32x64xf32>
    %2 = tpu.matmul %0, %1, %cst {dimension_numbers = #tpu.dot_dimension_numbers<[1], [0], [0], [1], [0, 0, 1, 1], [], []>} : vector<32x512xbf16>, vector<512x64xbf16>, vector<32x64xf32> -> vector<32x64xf32>
    %c0_3 = arith.constant 0 : index
    %c0_4 = arith.constant 0 : index
    %3 = vector.load %arg3[%c0_3, %c0_4] : memref<1x64xf32, #tpu.memory_space<vmem>>, vector<1x64xf32>
    %4 = vector.broadcast %3 : vector<1x64xf32> to vector<32x64xf32>
    %5 = arith.addf %2, %4 : vector<32x64xf32>
    %cst_5 = arith.constant 0.000000e+00 : f32
    %6 = vector.broadcast %cst_5 : f32 to vector<32x64xf32>
    %7 = arith.maximumf %5, %6 : vector<32x64xf32>
    %8 = arith.truncf %7 : vector<32x64xf32> to vector<32x64xbf16>
    %c0_6 = arith.constant 0 : index
    %c0_7 = arith.constant 0 : index
    %9 = vector.load %arg4[%c0_6, %c0_7] : memref<32x64xbf16, #tpu.memory_space<vmem>>, vector<32x64xbf16>
    tpu.vector_store %arg4[%c0_6, %c0_7], %8 {strides = array<i32>} : memref<32x64xbf16, #tpu.memory_space<vmem>>, vector<32x64xbf16>,
    return
  }
  func.func @transform_0(%arg0: i32) -> (i32, i32) {
    %c0_i32 = arith.constant 0 : i32
    %c0_i32_0 = arith.constant 0 : i32
    return %arg0, %c0_i32 : i32, i32
  }
  func.func @transform_1(%arg0: i32) -> (i32, i32) {
    %c0_i32 = arith.constant 0 : i32
    %c0_i32_0 = arith.constant 0 : i32
    %c0_i32_1 = arith.constant 0 : i32
    return %c0_i32, %c0_i32_0 : i32, i32
  }
  func.func @transform_2(%arg0: i32) -> (i32, i32) {
    %c0_i32 = arith.constant 0 : i32
    %c0_i32_0 = arith.constant 0 : i32
    %c0_i32_1 = arith.constant 0 : i32
    return %c0_i32, %c0_i32_0 : i32, i32
  }
  func.func @transform_3(%arg0: i32) -> (i32, i32) {
    %c0_i32 = arith.constant 0 : i32
    %c0_i32_0 = arith.constant 0 : i32
    return %arg0, %c0_i32 : i32, i32
  }
}

module attributes {stable_mosaic.version = 11 : i64} {
  func.func @_actor_tail_kernel(%arg0: i32, %arg1: memref<4x16x576xbf16, #tpu.memory_space<vmem>>, %arg2: memref<576x64xbf16, #tpu.memory_space<vmem>>, %arg3: memref<1x64xf32, #tpu.memory_space<vmem>>, %arg4: memref<4x64x512xbf16, #tpu.memory_space<vmem>>, %arg5: memref<1x512xf32, #tpu.memory_space<vmem>>, %arg6: memref<512x128xbf16, #tpu.memory_space<vmem>>, %arg7: memref<1x128xf32, #tpu.memory_space<vmem>>, %arg8: memref<16x128xf32, #tpu.memory_space<vmem>>, %arg9: memref<16x512xf32, #tpu.memory_space<vmem>>) attributes {dimension_semantics = [#tpu.dimension_semantics<parallel>], iteration_bounds = array<i64: 1>, scalar_prefetch = 0 : i64, scratch_operands = 1 : i64, tpu.core_type = #tpu.core_type<tc>, window_params = [{transform_indices = @transform_0, window_bounds = array<i64: 4, 16, 576>}, {pipeline_mode = #tpu.pipeline_mode<synchronous>, transform_indices = @transform_1, window_bounds = array<i64: 576, 64>}, {pipeline_mode = #tpu.pipeline_mode<synchronous>, transform_indices = @transform_2, window_bounds = array<i64: 1, 64>}, {pipeline_mode = #tpu.pipeline_mode<synchronous>, transform_indices = @transform_3, window_bounds = array<i64: 4, 64, 512>}, {pipeline_mode = #tpu.pipeline_mode<synchronous>, transform_indices = @transform_4, window_bounds = array<i64: 1, 512>}, {pipeline_mode = #tpu.pipeline_mode<synchronous>, transform_indices = @transform_5, window_bounds = array<i64: 512, 128>}, {pipeline_mode = #tpu.pipeline_mode<synchronous>, transform_indices = @transform_6, window_bounds = array<i64: 1, 128>}, {transform_indices = @transform_7, window_bounds = array<i64: 16, 128>}]} {
    %cst = arith.constant 0.000000e+00 : f32
    %0 = vector.broadcast %cst : f32 to vector<16x512xf32>
    %c0 = arith.constant 0 : index
    %c0_0 = arith.constant 0 : index
    %1 = vector.load %arg9[%c0, %c0_0] : memref<16x512xf32, #tpu.memory_space<vmem>>, vector<16x512xf32>
    tpu.vector_store %arg9[%c0, %c0_0], %0 {strides = array<i32>} : memref<16x512xf32, #tpu.memory_space<vmem>>, vector<16x512xf32>,
    %c0_i32 = arith.constant 0 : i32
    %c4_i32 = arith.constant 4 : i32
    %2 = arith.addi %c0_i32, %c4_i32 : i32
    %c1_i32 = arith.constant 1 : i32
    scf.for %arg10 = %c0_i32 to %2 step %c1_i32  : i32 {
      %16 = arith.index_cast %arg10 : i32 to index
      %c0_14 = arith.constant 0 : index
      %c0_15 = arith.constant 0 : index
      %17 = vector.load %arg1[%16, %c0_14, %c0_15] : memref<4x16x576xbf16, #tpu.memory_space<vmem>>, vector<1x16x576xbf16>
      %18 = vector.shape_cast %17 : vector<1x16x576xbf16> to vector<16x576xbf16>
      %c0_16 = arith.constant 0 : index
      %c0_17 = arith.constant 0 : index
      %19 = vector.load %arg2[%c0_16, %c0_17] : memref<576x64xbf16, #tpu.memory_space<vmem>>, vector<576x64xbf16>
      %cst_18 = arith.constant dense<0.000000e+00> : vector<16x64xf32>
      %20 = tpu.matmul %18, %19, %cst_18 {dimension_numbers = #tpu.dot_dimension_numbers<[1], [0], [0], [1], [0, 0, 1, 1], [], []>} : vector<16x576xbf16>, vector<576x64xbf16>, vector<16x64xf32> -> vector<16x64xf32>
      %c0_19 = arith.constant 0 : index
      %c0_20 = arith.constant 0 : index
      %21 = vector.load %arg3[%c0_19, %c0_20] : memref<1x64xf32, #tpu.memory_space<vmem>>, vector<1x64xf32>
      %22 = vector.broadcast %21 : vector<1x64xf32> to vector<16x64xf32>
      %23 = arith.addf %20, %22 : vector<16x64xf32>
      %cst_21 = arith.constant 0.000000e+00 : f32
      %24 = vector.broadcast %cst_21 : f32 to vector<16x64xf32>
      %25 = arith.maximumf %23, %24 : vector<16x64xf32>
      %26 = arith.truncf %25 : vector<16x64xf32> to vector<16x64xbf16>
      %c0_22 = arith.constant 0 : index
      %c0_23 = arith.constant 0 : index
      %27 = vector.load %arg9[%c0_22, %c0_23] : memref<16x512xf32, #tpu.memory_space<vmem>>, vector<16x512xf32>
      %28 = arith.index_cast %arg10 : i32 to index
      %c0_24 = arith.constant 0 : index
      %c0_25 = arith.constant 0 : index
      %29 = vector.load %arg4[%28, %c0_24, %c0_25] : memref<4x64x512xbf16, #tpu.memory_space<vmem>>, vector<1x64x512xbf16>
      %30 = vector.shape_cast %29 : vector<1x64x512xbf16> to vector<64x512xbf16>
      %cst_26 = arith.constant dense<0.000000e+00> : vector<16x512xf32>
      %31 = tpu.matmul %26, %30, %cst_26 {dimension_numbers = #tpu.dot_dimension_numbers<[1], [0], [0], [1], [0, 0, 1, 1], [], []>} : vector<16x64xbf16>, vector<64x512xbf16>, vector<16x512xf32> -> vector<16x512xf32>
      %32 = arith.addf %27, %31 : vector<16x512xf32>
      %c0_27 = arith.constant 0 : index
      %c0_28 = arith.constant 0 : index
      %33 = vector.load %arg9[%c0_27, %c0_28] : memref<16x512xf32, #tpu.memory_space<vmem>>, vector<16x512xf32>
      tpu.vector_store %arg9[%c0_27, %c0_28], %32 {strides = array<i32>} : memref<16x512xf32, #tpu.memory_space<vmem>>, vector<16x512xf32>,
    }
    %c4_i32_1 = arith.constant 4 : i32
    %c0_2 = arith.constant 0 : index
    %c0_3 = arith.constant 0 : index
    %3 = vector.load %arg9[%c0_2, %c0_3] : memref<16x512xf32, #tpu.memory_space<vmem>>, vector<16x512xf32>
    %c0_4 = arith.constant 0 : index
    %c0_5 = arith.constant 0 : index
    %4 = vector.load %arg5[%c0_4, %c0_5] : memref<1x512xf32, #tpu.memory_space<vmem>>, vector<1x512xf32>
    %5 = vector.broadcast %4 : vector<1x512xf32> to vector<16x512xf32>
    %6 = arith.addf %3, %5 : vector<16x512xf32>
    %cst_6 = arith.constant 0.000000e+00 : f32
    %7 = vector.broadcast %cst_6 : f32 to vector<16x512xf32>
    %8 = arith.maximumf %6, %7 : vector<16x512xf32>
    %9 = arith.truncf %8 : vector<16x512xf32> to vector<16x512xbf16>
    %c0_7 = arith.constant 0 : index
    %c0_8 = arith.constant 0 : index
    %10 = vector.load %arg6[%c0_7, %c0_8] : memref<512x128xbf16, #tpu.memory_space<vmem>>, vector<512x128xbf16>
    %cst_9 = arith.constant dense<0.000000e+00> : vector<16x128xf32>
    %11 = tpu.matmul %9, %10, %cst_9 {dimension_numbers = #tpu.dot_dimension_numbers<[1], [0], [0], [1], [0, 0, 1, 1], [], []>} : vector<16x512xbf16>, vector<512x128xbf16>, vector<16x128xf32> -> vector<16x128xf32>
    %c0_10 = arith.constant 0 : index
    %c0_11 = arith.constant 0 : index
    %12 = vector.load %arg7[%c0_10, %c0_11] : memref<1x128xf32, #tpu.memory_space<vmem>>, vector<1x128xf32>
    %13 = vector.broadcast %12 : vector<1x128xf32> to vector<16x128xf32>
    %14 = arith.addf %11, %13 : vector<16x128xf32>
    %c0_12 = arith.constant 0 : index
    %c0_13 = arith.constant 0 : index
    %15 = vector.load %arg8[%c0_12, %c0_13] : memref<16x128xf32, #tpu.memory_space<vmem>>, vector<16x128xf32>
    tpu.vector_store %arg8[%c0_12, %c0_13], %14 {strides = array<i32>} : memref<16x128xf32, #tpu.memory_space<vmem>>, vector<16x128xf32>,
    return
  }
  func.func @transform_0(%arg0: i32) -> (i32, i32, i32) {
    %c0_i32 = arith.constant 0 : i32
    %c0_i32_0 = arith.constant 0 : i32
    %c0_i32_1 = arith.constant 0 : i32
    return %c0_i32, %arg0, %c0_i32_0 : i32, i32, i32
  }
  func.func @transform_1(%arg0: i32) -> (i32, i32) {
    %c0_i32 = arith.constant 0 : i32
    %c0_i32_0 = arith.constant 0 : i32
    %c0_i32_1 = arith.constant 0 : i32
    return %c0_i32, %c0_i32_0 : i32, i32
  }
  func.func @transform_2(%arg0: i32) -> (i32, i32) {
    %c0_i32 = arith.constant 0 : i32
    %c0_i32_0 = arith.constant 0 : i32
    %c0_i32_1 = arith.constant 0 : i32
    return %c0_i32, %c0_i32_0 : i32, i32
  }
  func.func @transform_3(%arg0: i32) -> (i32, i32, i32) {
    %c0_i32 = arith.constant 0 : i32
    %c0_i32_0 = arith.constant 0 : i32
    %c0_i32_1 = arith.constant 0 : i32
    %c0_i32_2 = arith.constant 0 : i32
    return %c0_i32, %c0_i32_0, %c0_i32_1 : i32, i32, i32
  }
  func.func @transform_4(%arg0: i32) -> (i32, i32) {
    %c0_i32 = arith.constant 0 : i32
    %c0_i32_0 = arith.constant 0 : i32
    %c0_i32_1 = arith.constant 0 : i32
    return %c0_i32, %c0_i32_0 : i32, i32
  }
  func.func @transform_5(%arg0: i32) -> (i32, i32) {
    %c0_i32 = arith.constant 0 : i32
    %c0_i32_0 = arith.constant 0 : i32
    %c0_i32_1 = arith.constant 0 : i32
    return %c0_i32, %c0_i32_0 : i32, i32
  }
  func.func @transform_6(%arg0: i32) -> (i32, i32) {
    %c0_i32 = arith.constant 0 : i32
    %c0_i32_0 = arith.constant 0 : i32
    %c0_i32_1 = arith.constant 0 : i32
    return %c0_i32, %c0_i32_0 : i32, i32
  }
  func.func @transform_7(%arg0: i32) -> (i32, i32) {
    %c0_i32 = arith.constant 0 : i32
    %c0_i32_0 = arith.constant 0 : i32
    return %arg0, %c0_i32 : i32, i32
  }
}

</mosaic_0001>

<bundles_post_ra>
// kernel: actor_forward.3
= control target key start
LH: loop header
LB: loop body
LE: loop exit
PB: predicated region body
PF: predicated region fallthrough
CT: control target
= control target key end

     0   :  { %vm573_vm0 = vcmask 257024   ;;  %s1145_s1 = inlined_call_operand.vmem [shape: bf16[256,32], index: 1, kind: input, shape index: {}]   ;;  %s1146_s0 = inlined_call_operand.vmem [shape: bf16[208,256], index: 0, kind: input, shape index: {}]   ;;  %s1147_s2 = inlined_call_operand.vmem [shape: f32[1,32], index: 2, kind: input, shape index: {}]   ;;  %s1148_s3 = inlined_call_operand.vmem [shape: bf16[208,32], index: 3, kind: output, shape index: {}]  }
   0x1   :  { %v809_v0 = vld [vmem:[%s1145_s1 + $0x40] sm:$0xff]   ;;  %v811_v2 = vld [vmem:[%s1145_s1 + $0x48] sm:$0xff]   ;;  %v813_v4 = vld [vmem:[%s1145_s1 + $0x50] sm:$0xff]  }
   0x2   :  { %v810_v1 = vld [vmem:[%s1145_s1] sm:$0xff]   ;;  %699 = vmatprep.subr.bf16.mxu0 %v809_v0  ;;  %793 = vmatprep.subr.bf16.mxu1 %v809_v0  ;;  %v812_v3 = vld [vmem:[%s1145_s1 + $0x8] sm:$0xff]   ;;  %v814_v5 = vld [vmem:[%s1145_s1 + $0x10] sm:$0xff]  }
   0x3   :  { %700 = vmatpush3.bf16.msra.mxu0 %v810_v1  ;;  %801 = vmatpush3.bf16.msra.mxu1 %v810_v1  ;;  %v815_v6 = vld [vmem:[%s1145_s1 + $0x58] sm:$0xff]   ;;  %v817_v8 = vld [vmem:[%s1145_s1 + $0x60] sm:$0xff]   ;;  %v819_v10 = vld [vmem:[%s1145_s1 + $0x68] sm:$0xff]  }
   0x4   :  { %701 = vmatprep.subr.bf16.mxu0 %v811_v2  ;;  %794 = vmatprep.subr.bf16.mxu1 %v811_v2  ;;  %v816_v7 = vld [vmem:[%s1145_s1 + $0x18] sm:$0xff]   ;;  %v818_v9 = vld [vmem:[%s1145_s1 + $0x20] sm:$0xff]   ;;  %v820_v13 = vld [vmem:[%s1145_s1 + $0x28] sm:$0xff]  }
   0x5   :  { %v827_v11 = vld [vmem:[%s1146_s0 + $0x4] ss:$8 sps:$4 sm:$0xff]   ;;  %v830_v12 = vld [vmem:[%s1146_s0 + $0x74] ss:$8 sps:$4 sm:$0xff]   ;;  %v825_v18 = vld [vmem:[%s1146_s0] ss:$8 sps:$4 sm:$0xff]  }
   0x6   :  { %v821_v14 = vld [vmem:[%s1145_s1 + $0x70] sm:$0xff]   ;;  %338 = vmatprep.mubr.bf16.mxu0 %v827_v11  ;;  %394 = vmatprep.mubr.bf16.mxu1 %v830_v12  ;;  %v823_v16 = vld [vmem:[%s1145_s1 + $0x78] sm:$0xff]   ;;  %v834_v21 = vld [vmem:[%s1146_s0 + $0x84] ss:$8 sps:$4 sm:$0xff]  }
   0x7   :  { %702 = vmatpush3.bf16.msra.mxu0 %v812_v3  ;;  %802 = vmatpush3.bf16.msra.mxu1 %v812_v3  ;;  %v822_v15 = vld [vmem:[%s1145_s1 + $0x30] sm:$0xff]   ;;  %v824_v17 = vld [vmem:[%s1145_s1 + $0x38] sm:$0xff]   ;;  %v836_v23 = vld [vmem:[%s1146_s0 + $0x80] ss:$8 sps:$4 sm:$0xff]  }
   0x8   :  { %703 = vmatprep.subr.bf16.mxu0 %v813_v4  ;;  %795 = vmatprep.subr.bf16.mxu1 %v813_v4  ;;  %v828_v19 = vld [vmem:[%s1146_s0 + $0x70] ss:$8 sps:$4 sm:$0xff]   ;;  %v831_v20 = vld [vmem:[%s1146_s0 + $0x14] ss:$8 sps:$4 sm:$0xff]   ;;  %v837_v24 = vld [vmem:[%s1146_s0 + $0x24] ss:$8 sps:$4 sm:$0xff]  }
   0x9   :  { %v833_v22 = vld [vmem:[%s1146_s0 + $0x10] ss:$8 sps:$4 sm:$0xff]   ;;  %v840_v25 = vld [vmem:[%s1146_s0 + $0x94] ss:$8 sps:$4 sm:$0xff]   ;;  %v839_v26 = vld [vmem:[%s1146_s0 + $0x20] ss:$8 sps:$4 sm:$0xff]  }
   0xa   :  { %v842_v27 = vld [vmem:[%s1146_s0 + $0x90] ss:$8 sps:$4 sm:$0xff]   ;;  %v843_v28 = vld [vmem:[%s1146_s0 + $0x34] ss:$8 sps:$4 sm:$0xff]   ;;  %v846_v29 = vld [vmem:[%s1146_s0 + $0xa4] ss:$8 sps:$4 sm:$0xff]  }
   0xb   :  { %704 = vmatpush3.bf16.msra.mxu0 %v814_v5  ;;  %803 = vmatpush3.bf16.msra.mxu1 %v814_v5  ;;  %v845_v30 = vld [vmem:[%s1146_s0 + $0x30] ss:$8 sps:$4 sm:$0xff]   ;;  %v848_v31 = vld [vmem:[%s1146_s0 + $0xa0] ss:$8 sps:$4 sm:$0xff]   ;;  %v849_v32 = vld [vmem:[%s1146_s0 + $0x44] ss:$8 sps:$4 sm:$0xff]  }
   0xc   :  { %705 = vmatprep.subr.bf16.mxu0 %v815_v6  ;;  %796 = vmatprep.subr.bf16.mxu1 %v815_v6  ;;  %v852_v33 = vld [vmem:[%s1146_s0 + $0xb4] ss:$8 sps:$4 sm:$0xff]   ;;  %v851_v34 = vld [vmem:[%s1146_s0 + $0x40] ss:$8 sps:$4 sm:$0xff]   ;;  %v854_v35 = vld [vmem:[%s1146_s0 + $0xb0] ss:$8 sps:$4 sm:$0xff]  }
   0xd   :  { %v855_v36 = vld [vmem:[%s1146_s0 + $0x54] ss:$8 sps:$4 sm:$0xff]   ;;  %v858_v37 = vld [vmem:[%s1146_s0 + $0xc4] ss:$8 sps:$4 sm:$0xff]   ;;  %v857_v38 = vld [vmem:[%s1146_s0 + $0x50] ss:$8 sps:$4 sm:$0xff]  }
   0xe   :  { %v860_v39 = vld [vmem:[%s1146_s0 + $0xc0] ss:$8 sps:$4 sm:$0xff]   ;;  %v861_v40 = vld [vmem:[%s1146_s0 + $0x64] ss:$8 sps:$4 sm:$0xff]  }
   0xf   :  { %706 = vmatpush3.bf16.msra.mxu0 %v816_v7  ;;  %804 = vmatpush3.bf16.msra.mxu1 %v816_v7  ;;  %v863_v41 = vld [vmem:[%s1146_s0 + $0x60] ss:$8 sps:$4 sm:$0xff]  }
  0x10   :  { %707 = vmatprep.subr.bf16.mxu0 %v817_v8  ;;  %797 = vmatprep.subr.bf16.mxu1 %v817_v8  ;;  %v1013_v44 = vld [vmem:[%s1147_s2] ss:$0 sm:$0xff] }
  0x13   :  { %708 = vmatpush3.bf16.msra.mxu0 %v818_v9  ;;  %805 = vmatpush3.bf16.msra.mxu1 %v818_v9 }
  0x14   :  { %709 = vmatprep.subr.bf16.mxu0 %v819_v10  ;;  %798 = vmatprep.subr.bf16.mxu1 %v819_v10 }
  0x17   :  { %710 = vmatpush3.bf16.msra.mxu0 %v820_v13  ;;  %806 = vmatpush3.bf16.msra.mxu1 %v820_v13 }
  0x18   :  { %711 = vmatprep.subr.bf16.mxu0 %v821_v14  ;;  %799 = vmatprep.subr.bf16.mxu1 %v821_v14 }
  0x1b   :  { %712 = vmatpush3.bf16.msra.mxu0 %v822_v15  ;;  %807 = vmatpush3.bf16.msra.mxu1 %v822_v15 }
  0x1c   :  { %713 = vmatprep.subr.bf16.mxu0 %v823_v16  ;;  %800 = vmatprep.subr.bf16.mxu1 %v823_v16 }
  0x1f   :  { %714 = vmatpush3.bf16.msra.mxu0 %v824_v17  ;;  %808 = vmatpush3.bf16.msra.mxu1 %v824_v17 }
  0x22   :  { %339 = vmatmul.mubr.bf16.vlgmr.msra.gmra.mrb[0].mxu0 %v825_v18  ;;  %395 = vmatmul.mubr.bf16.vlgmr.msra.gmra.mrb[0].mxu1 %v828_v19 }
  0x23   :  { %346 = vmatprep.mubr.bf16.mxu0 %v831_v20  ;;  %402 = vmatprep.mubr.bf16.mxu1 %v834_v21 }
  0x2a   :  { %347 = vmatmul.mubr.bf16.gmra.mrb[4].mxu0 %v833_v22  ;;  %403 = vmatmul.mubr.bf16.gmra.mrb[4].mxu1 %v836_v23 }
  0x2b   :  { %354 = vmatprep.mubr.bf16.mxu0 %v837_v24  ;;  %410 = vmatprep.mubr.bf16.mxu1 %v840_v25 }
  0x32   :  { %355 = vmatmul.mubr.bf16.gmra.mrb[8].mxu0 %v839_v26  ;;  %411 = vmatmul.mubr.bf16.gmra.mrb[8].mxu1 %v842_v27 }
  0x33   :  { %362 = vmatprep.mubr.bf16.mxu0 %v843_v28  ;;  %418 = vmatprep.mubr.bf16.mxu1 %v846_v29 }
  0x3a   :  { %363 = vmatmul.mubr.bf16.gmra.mrb[12].mxu0 %v845_v30  ;;  %419 = vmatmul.mubr.bf16.gmra.mrb[12].mxu1 %v848_v31 }
  0x3b   :  { %370 = vmatprep.mubr.bf16.mxu0 %v849_v32  ;;  %426 = vmatprep.mubr.bf16.mxu1 %v852_v33 }
  0x42   :  { %371 = vmatmul.mubr.bf16.gmra.mrb[16].mxu0 %v851_v34  ;;  %427 = vmatmul.mubr.bf16.gmra.mrb[16].mxu1 %v854_v35 }
  0x43   :  { %378 = vmatprep.mubr.bf16.mxu0 %v855_v36  ;;  %434 = vmatprep.mubr.bf16.mxu1 %v858_v37 }
  0x4a   :  { %379 = vmatmul.mubr.bf16.gmra.mrb[20].mxu0 %v857_v38  ;;  %435 = vmatmul.mubr.bf16.gmra.mrb[20].mxu1 %v860_v39 }
  0x4b   :  { %386 = vmatprep.mubr.bf16.mxu0 %v861_v40 }
  0x52   :  { %387 = vmatmul.mubr.bf16.gmra.mrb[24].mxu0 %v863_v41 }
  0xf5   :  { %v715_v42 = vpop.f32.mrb[0].mxu0  ;;  %v757_v43 = vpop.f32.mrb[0].mxu1 }
  0xf6   :  { %v716_v45 = vpop.f32.mrb[1].mxu0  ;;  %v758_v46 = vpop.f32.mrb[1].mxu1 }
  0xf7   :  { %v717_v47 = vadd.f32 %v716_v45, %v715_v42  ;;  %v718_v48 = vpop.f32.mrb[2].mxu0  ;;  %v759_v49 = vadd.f32 %v758_v46, %v757_v43  ;;  %v760_v50 = vpop.f32.mrb[2].mxu1 }
  0xf8   :  { %v719_v51 = vpop.f32.mrb[3].mxu0  ;;  %v761_v52 = vpop.f32.mrb[3].mxu1 }
  0xf9   :  { %v341_v53 = vadd.f32 %v717_v47, %v1013_v44  ;;  %v720_v54 = vadd.f32 %v719_v51, %v718_v48  ;;  %v397_v55 = vadd.f32 %v759_v49, %v1013_v44  ;;  %v762_v56 = vadd.f32 %v761_v52, %v760_v50 }
  0xfb   :  { %v443_v57 = vmax.f32 %v341_v53, 0.0  ;;  %v344_v58 = vadd.f32 %v720_v54, %v1013_v44  ;;  %v457_v59 = vmax.f32 %v397_v55, 0.0  ;;  %v400_v60 = vadd.f32 %v762_v56, %v1013_v44 }
  0xfd   :  { %v673_v61 = vpack.c.bf16 %v443_v57, %v443_v57  ;;  %v444_v62 = vmax.f32 %v344_v58, 0.0  ;;  %v687_v63 = vpack.c.bf16 %v457_v59, %v457_v59  ;;  %v721_v0 = vpop.f32.mrb[4].mxu0  ;;  %v458_v1 = vmax.f32 %v400_v60, 0.0  ;;  %v763_v2 = vpop.f32.mrb[4].mxu1 }
  0xfe   :  { %v722_v3 = vpop.f32.mrb[5].mxu0  ;;  %v764_v4 = vpop.f32.mrb[5].mxu1 }
  0xff   :  { %574 = vst.msk [vmem:[%s1148_s3] sm:$0xf] %vm573_vm0, %v673_v61  ;;  %v674_v5 = vpack.c.bf16 %v444_v62, %v444_v62  ;;  %588 = vst.msk [vmem:[%s1148_s3 + $0x38] sm:$0xf] %vm573_vm0, %v687_v63  ;;  %v688_v6 = vpack.c.bf16 %v458_v1, %v458_v1  ;;  %v723_v7 = vadd.f32 %v722_v3, %v721_v0  ;;  %v724_v8 = vpop.f32.mrb[6].mxu0  ;;  %v766_v10 = vpop.f32.mrb[6].mxu1 }
 0x100   :  { %v765_v9 = vadd.f32 %v764_v4, %v763_v2  ;;  %v725_v11 = vpop.f32.mrb[7].mxu0  ;;  %v767_v12 = vpop.f32.mrb[7].mxu1 }
 0x101   :  { %575 = vst.msk [vmem:[%s1148_s3 + $0x4] sm:$0xf] %vm573_vm0, %v674_v5  ;;  %589 = vst.msk [vmem:[%s1148_s3 + $0x3c] sm:$0xf] %vm573_vm0, %v688_v6  ;;  %v349_v13 = vadd.f32 %v723_v7, %v1013_v44  ;;  %v726_v14 = vadd.f32 %v725_v11, %v724_v8  ;;  %v768_v16 = vadd.f32 %v767_v12, %v766_v10 }
 0x102   :  { %v405_v15 = vadd.f32 %v765_v9, %v1013_v44 }
 0x103   :  { %v445_v17 = vmax.f32 %v349_v13, 0.0  ;;  %v352_v18 = vadd.f32 %v726_v14, %v1013_v44  ;;  %v408_v20 = vadd.f32 %v768_v16, %v1013_v44 }
 0x104   :  { %v459_v19 = vmax.f32 %v405_v15, 0.0 }
 0x105   :  { %v675_v21 = vpack.c.bf16 %v445_v17, %v445_v17  ;;  %v446_v22 = vmax.f32 %v352_v18, 0.0  ;;  %v727_v24 = vpop.f32.mrb[8].mxu0  ;;  %v460_v25 = vmax.f32 %v408_v20, 0.0  ;;  %v769_v26 = vpop.f32.mrb[8].mxu1 }
 0x106   :  { %v689_v23 = vpack.c.bf16 %v459_v19, %v459_v19  ;;  %v728_v27 = vpop.f32.mrb[9].mxu0  ;;  %v770_v28 = vpop.f32.mrb[9].mxu1 }
 0x107   :  { %576 = vst.msk [vmem:[%s1148_s3 + $0x8] sm:$0xf] %vm573_vm0, %v675_v21  ;;  %v676_v29 = vpack.c.bf16 %v446_v22, %v446_v22  ;;  %v690_v30 = vpack.c.bf16 %v460_v25, %v460_v25  ;;  %v729_v31 = vadd.f32 %v728_v27, %v727_v24  ;;  %v730_v32 = vpop.f32.mrb[10].mxu0  ;;  %v771_v33 = vadd.f32 %v770_v28, %v769_v26  ;;  %v772_v34 = vpop.f32.mrb[10].mxu1 }
 0x108   :  { %590 = vst.msk [vmem:[%s1148_s3 + $0x40] sm:$0xf] %vm573_vm0, %v689_v23  ;;  %v731_v35 = vpop.f32.mrb[11].mxu0  ;;  %v773_v36 = vpop.f32.mrb[11].mxu1 }
 0x109   :  { %577 = vst.msk [vmem:[%s1148_s3 + $0xc] sm:$0xf] %vm573_vm0, %v676_v29  ;;  %591 = vst.msk [vmem:[%s1148_s3 + $0x44] sm:$0xf] %vm573_vm0, %v690_v30  ;;  %v357_v37 = vadd.f32 %v729_v31, %v1013_v44  ;;  %v732_v38 = vadd.f32 %v731_v35, %v730_v32  ;;  %v413_v39 = vadd.f32 %v771_v33, %v1013_v44 }
 0x10a   :  { %v774_v40 = vadd.f32 %v773_v36, %v772_v34 }
 0x10b   :  { %v447_v41 = vmax.f32 %v357_v37, 0.0  ;;  %v360_v42 = vadd.f32 %v732_v38, %v1013_v44  ;;  %v461_v43 = vmax.f32 %v413_v39, 0.0 }
 0x10c   :  { %v416_v45 = vadd.f32 %v774_v40, %v1013_v44 }
 0x10d   :  { %v677_v46 = vpack.c.bf16 %v447_v41, %v447_v41  ;;  %v448_v47 = vmax.f32 %v360_v42, 0.0  ;;  %v691_v48 = vpack.c.bf16 %v461_v43, %v461_v43  ;;  %v733_v49 = vpop.f32.mrb[12].mxu0  ;;  %v775_v51 = vpop.f32.mrb[12].mxu1 }
 0x10e   :  { %v462_v50 = vmax.f32 %v416_v45, 0.0  ;;  %v734_v52 = vpop.f32.mrb[13].mxu0  ;;  %v776_v53 = vpop.f32.mrb[13].mxu1 }
 0x10f   :  { %578 = vst.msk [vmem:[%s1148_s3 + $0x10] sm:$0xf] %vm573_vm0, %v677_v46  ;;  %v678_v54 = vpack.c.bf16 %v448_v47, %v448_v47  ;;  %592 = vst.msk [vmem:[%s1148_s3 + $0x48] sm:$0xf] %vm573_vm0, %v691_v48  ;;  %v735_v56 = vadd.f32 %v734_v52, %v733_v49  ;;  %v736_v57 = vpop.f32.mrb[14].mxu0  ;;  %v777_v58 = vadd.f32 %v776_v53, %v775_v51  ;;  %v778_v59 = vpop.f32.mrb[14].mxu1 }
 0x110   :  { %v692_v55 = vpack.c.bf16 %v462_v50, %v462_v50  ;;  %v737_v60 = vpop.f32.mrb[15].mxu0  ;;  %v779_v61 = vpop.f32.mrb[15].mxu1 }
 0x111   :  { %579 = vst.msk [vmem:[%s1148_s3 + $0x14] sm:$0xf] %vm573_vm0, %v678_v54  ;;  %v365_v62 = vadd.f32 %v735_v56, %v1013_v44  ;;  %v738_v63 = vadd.f32 %v737_v60, %v736_v57  ;;  %v421_v0 = vadd.f32 %v777_v58, %v1013_v44  ;;  %v780_v1 = vadd.f32 %v779_v61, %v778_v59 }
 0x112   :  { %593 = vst.msk [vmem:[%s1148_s3 + $0x4c] sm:$0xf] %vm573_vm0, %v692_v55 }
 0x113   :  { %v449_v2 = vmax.f32 %v365_v62, 0.0  ;;  %v368_v3 = vadd.f32 %v738_v63, %v1013_v44  ;;  %v463_v4 = vmax.f32 %v421_v0, 0.0  ;;  %v424_v5 = vadd.f32 %v780_v1, %v1013_v44 }
 0x115   :  { %v679_v6 = vpack.c.bf16 %v449_v2, %v449_v2  ;;  %v450_v7 = vmax.f32 %v368_v3, 0.0  ;;  %v693_v8 = vpack.c.bf16 %v463_v4, %v463_v4  ;;  %v739_v9 = vpop.f32.mrb[16].mxu0  ;;  %v464_v10 = vmax.f32 %v424_v5, 0.0  ;;  %v781_v11 = vpop.f32.mrb[16].mxu1 }
 0x116   :  { %v740_v12 = vpop.f32.mrb[17].mxu0  ;;  %v782_v13 = vpop.f32.mrb[17].mxu1 }
 0x117   :  { %580 = vst.msk [vmem:[%s1148_s3 + $0x18] sm:$0xf] %vm573_vm0, %v679_v6  ;;  %v680_v14 = vpack.c.bf16 %v450_v7, %v450_v7  ;;  %594 = vst.msk [vmem:[%s1148_s3 + $0x50] sm:$0xf] %vm573_vm0, %v693_v8  ;;  %v694_v15 = vpack.c.bf16 %v464_v10, %v464_v10  ;;  %v741_v16 = vadd.f32 %v740_v12, %v739_v9  ;;  %v742_v17 = vpop.f32.mrb[18].mxu0  ;;  %v784_v19 = vpop.f32.mrb[18].mxu1 }
 0x118   :  { %v783_v18 = vadd.f32 %v782_v13, %v781_v11  ;;  %v743_v20 = vpop.f32.mrb[19].mxu0  ;;  %v785_v21 = vpop.f32.mrb[19].mxu1 }
 0x119   :  { %581 = vst.msk [vmem:[%s1148_s3 + $0x1c] sm:$0xf] %vm573_vm0, %v680_v14  ;;  %595 = vst.msk [vmem:[%s1148_s3 + $0x54] sm:$0xf] %vm573_vm0, %v694_v15  ;;  %v373_v22 = vadd.f32 %v741_v16, %v1013_v44  ;;  %v744_v23 = vadd.f32 %v743_v20, %v742_v17  ;;  %v786_v25 = vadd.f32 %v785_v21, %v784_v19 }
 0x11a   :  { %v429_v24 = vadd.f32 %v783_v18, %v1013_v44 }
 0x11b   :  { %v451_v26 = vmax.f32 %v373_v22, 0.0  ;;  %v376_v27 = vadd.f32 %v744_v23, %v1013_v44  ;;  %v432_v29 = vadd.f32 %v786_v25, %v1013_v44 }
 0x11c   :  { %v465_v28 = vmax.f32 %v429_v24, 0.0 }
 0x11d   :  { %v681_v30 = vpack.c.bf16 %v451_v26, %v451_v26  ;;  %v452_v31 = vmax.f32 %v376_v27, 0.0  ;;  %v745_v33 = vpop.f32.mrb[20].mxu0  ;;  %v466_v34 = vmax.f32 %v432_v29, 0.0  ;;  %v787_v35 = vpop.f32.mrb[20].mxu1 }
 0x11e   :  { %v695_v32 = vpack.c.bf16 %v465_v28, %v465_v28  ;;  %v746_v36 = vpop.f32.mrb[21].mxu0  ;;  %v788_v37 = vpop.f32.mrb[21].mxu1 }
 0x11f   :  { %582 = vst.msk [vmem:[%s1148_s3 + $0x20] sm:$0xf] %vm573_vm0, %v681_v30  ;;  %v682_v38 = vpack.c.bf16 %v452_v31, %v452_v31  ;;  %v696_v39 = vpack.c.bf16 %v466_v34, %v466_v34  ;;  %v747_v40 = vadd.f32 %v746_v36, %v745_v33  ;;  %v748_v41 = vpop.f32.mrb[22].mxu0  ;;  %v789_v42 = vadd.f32 %v788_v37, %v787_v35  ;;  %v790_v43 = vpop.f32.mrb[22].mxu1 }
 0x120   :  { %596 = vst.msk [vmem:[%s1148_s3 + $0x58] sm:$0xf] %vm573_vm0, %v695_v32  ;;  %v749_v45 = vpop.f32.mrb[23].mxu0  ;;  %v791_v46 = vpop.f32.mrb[23].mxu1 }
 0x121   :  { %583 = vst.msk [vmem:[%s1148_s3 + $0x24] sm:$0xf] %vm573_vm0, %v682_v38  ;;  %597 = vst.msk [vmem:[%s1148_s3 + $0x5c] sm:$0xf] %vm573_vm0, %v696_v39  ;;  %v381_v47 = vadd.f32 %v747_v40, %v1013_v44  ;;  %v750_v48 = vadd.f32 %v749_v45, %v748_v41  ;;  %v437_v49 = vadd.f32 %v789_v42, %v1013_v44 }
 0x122   :  { %v792_v50 = vadd.f32 %v791_v46, %v790_v43 }
 0x123   :  { %v453_v51 = vmax.f32 %v381_v47, 0.0  ;;  %v384_v52 = vadd.f32 %v750_v48, %v1013_v44  ;;  %v467_v53 = vmax.f32 %v437_v49, 0.0 }
 0x124   :  { %v440_v54 = vadd.f32 %v792_v50, %v1013_v44 }
 0x125   :  { %v683_v55 = vpack.c.bf16 %v453_v51, %v453_v51  ;;  %v454_v56 = vmax.f32 %v384_v52, 0.0  ;;  %v697_v57 = vpack.c.bf16 %v467_v53, %v467_v53  ;;  %v751_v58 = vpop.f32.mrb[24].mxu0 }
 0x126   :  { %v468_v59 = vmax.f32 %v440_v54, 0.0  ;;  %v752_v60 = vpop.f32.mrb[25].mxu0 }
 0x127   :  { %584 = vst.msk [vmem:[%s1148_s3 + $0x28] sm:$0xf] %vm573_vm0, %v683_v55  ;;  %v684_v61 = vpack.c.bf16 %v454_v56, %v454_v56  ;;  %598 = vst.msk [vmem:[%s1148_s3 + $0x60] sm:$0xf] %vm573_vm0, %v697_v57  ;;  %v753_v63 = vadd.f32 %v752_v60, %v751_v58  ;;  %v754_v0 = vpop.f32.mrb[26].mxu0 }
 0x128   :  { %v698_v62 = vpack.c.bf16 %v468_v59, %v468_v59  ;;  %v755_v1 = vpop.f32.mrb[27].mxu0 }
 0x129   :  { %585 = vst.msk [vmem:[%s1148_s3 + $0x2c] sm:$0xf] %vm573_vm0, %v684_v61  ;;  %v389_v2 = vadd.f32 %v753_v63, %v1013_v44  ;;  %v756_v3 = vadd.f32 %v755_v1, %v754_v0 }
 0x12a   :  { %599 = vst.msk [vmem:[%s1148_s3 + $0x64] sm:$0xf] %vm573_vm0, %v698_v62 }
 0x12b   :  { %v455_v4 = vmax.f32 %v389_v2, 0.0  ;;  %v392_v5 = vadd.f32 %v756_v3, %v1013_v44 }
 0x12d   :  { %v685_v6 = vpack.c.bf16 %v455_v4, %v455_v4  ;;  %v456_v7 = vmax.f32 %v392_v5, 0.0 }
 0x12f   :  { %586 = vst.msk [vmem:[%s1148_s3 + $0x30] sm:$0xf] %vm573_vm0, %v685_v6  ;;  %v686_v8 = vpack.c.bf16 %v456_v7, %v456_v7 }
 0x131   :  { %587 = vst.msk [vmem:[%s1148_s3 + $0x34] sm:$0xf] %vm573_vm0, %v686_v8 }

// kernel: actor_forward.4
= control target key start
LH: loop header
LB: loop body
LE: loop exit
PB: predicated region body
PF: predicated region fallthrough
CT: control target
= control target key end

     0   :  { %vm444_vm0 = vcmask 519168   ;;  %s761_s1 = inlined_call_operand.vmem [shape: bf16[512,64], index: 1, kind: input, shape index: {}]   ;;  %s762_s0 = inlined_call_operand.vmem [shape: bf16[32,512], index: 0, kind: input, shape index: {}]   ;;  %s763_s2 = inlined_call_operand.vmem [shape: f32[1,64], index: 2, kind: input, shape index: {}]   ;;  %s764_s3 = inlined_call_operand.vmem [shape: bf16[32,64], index: 3, kind: output, shape index: {}]  }
   0x1   :  { %v558_v0 = vld [vmem:[%s761_s1 + $0x40] sm:$0xff]   ;;  %v562_v4 = vld [vmem:[%s761_s1 + $0x48] sm:$0xff]   ;;  %v566_v8 = vld [vmem:[%s761_s1 + $0x50] sm:$0xff]  }
   0x2   :  { %v559_v1 = vld [vmem:[%s761_s1 + $0xc0] sm:$0xff]   ;;  %502 = vmatprep.subr.bf16.mxu0 %v558_v0  ;;  %v563_v5 = vld [vmem:[%s761_s1 + $0xc8] sm:$0xff]   ;;  %v567_v9 = vld [vmem:[%s761_s1 + $0xd0] sm:$0xff]  }
   0x3   :  { %v560_v2 = vld [vmem:[%s761_s1] sm:$0xff]   ;;  %530 = vmatprep.subr.bf16.mxu1 %v559_v1  ;;  %v564_v6 = vld [vmem:[%s761_s1 + $0x8] sm:$0xff]   ;;  %v568_v10 = vld [vmem:[%s761_s1 + $0x10] sm:$0xff]  }
   0x4   :  { %v561_v3 = vld [vmem:[%s761_s1 + $0x80] sm:$0xff]   ;;  %503 = vmatpush3.bf16.msra.mxu0 %v560_v2  ;;  %v565_v7 = vld [vmem:[%s761_s1 + $0x88] sm:$0xff]   ;;  %v569_v11 = vld [vmem:[%s761_s1 + $0x90] sm:$0xff]  }
   0x5   :  { %531 = vmatpush3.bf16.msra.mxu1 %v561_v3  ;;  %504 = vmatprep.subr.bf16.mxu0 %v562_v4  ;;  %v570_v12 = vld [vmem:[%s761_s1 + $0x58] sm:$0xff]   ;;  %v574_v16 = vld [vmem:[%s761_s1 + $0x60] sm:$0xff]   ;;  %v578_v20 = vld [vmem:[%s761_s1 + $0x68] sm:$0xff]  }
   0x6   :  { %532 = vmatprep.subr.bf16.mxu1 %v563_v5  ;;  %v571_v13 = vld [vmem:[%s761_s1 + $0xd8] sm:$0xff]   ;;  %v575_v17 = vld [vmem:[%s761_s1 + $0xe0] sm:$0xff]   ;;  %v579_v21 = vld [vmem:[%s761_s1 + $0xe8] sm:$0xff]  }
   0x7   :  { %v572_v14 = vld [vmem:[%s761_s1 + $0x18] sm:$0xff]   ;;  %v576_v18 = vld [vmem:[%s761_s1 + $0x20] sm:$0xff]   ;;  %v580_v22 = vld [vmem:[%s761_s1 + $0x28] sm:$0xff]  }
   0x8   :  { %505 = vmatpush3.bf16.msra.mxu0 %v564_v6  ;;  %v573_v15 = vld [vmem:[%s761_s1 + $0x98] sm:$0xff]   ;;  %v577_v19 = vld [vmem:[%s761_s1 + $0xa0] sm:$0xff]   ;;  %v581_v23 = vld [vmem:[%s761_s1 + $0xa8] sm:$0xff]  }
   0x9   :  { %533 = vmatpush3.bf16.msra.mxu1 %v565_v7  ;;  %506 = vmatprep.subr.bf16.mxu0 %v566_v8  ;;  %v582_v24 = vld [vmem:[%s761_s1 + $0x70] sm:$0xff]   ;;  %v586_v28 = vld [vmem:[%s761_s1 + $0x78] sm:$0xff]   ;;  %v453_v42 = vld [vmem:[%s763_s2] ss:$0 sm:$0xff] }
   0xa   :  { %534 = vmatprep.subr.bf16.mxu1 %v567_v9  ;;  %v583_v25 = vld [vmem:[%s761_s1 + $0xf0] sm:$0xff]   ;;  %v587_v29 = vld [vmem:[%s761_s1 + $0xf8] sm:$0xff]  }
   0xb   :  { %v584_v26 = vld [vmem:[%s761_s1 + $0x30] sm:$0xff]   ;;  %v588_v30 = vld [vmem:[%s761_s1 + $0x38] sm:$0xff]  }
   0xc   :  { %507 = vmatpush3.bf16.msra.mxu0 %v568_v10  ;;  %v585_v27 = vld [vmem:[%s761_s1 + $0xb0] sm:$0xff]   ;;  %v589_v31 = vld [vmem:[%s761_s1 + $0xb8] sm:$0xff]  }
   0xd   :  { %535 = vmatpush3.bf16.msra.mxu1 %v569_v11  ;;  %508 = vmatprep.subr.bf16.mxu0 %v570_v12  ;;  %v590_v32 = vld [vmem:[%s762_s0] ss:$16 sps:$4 sm:$0xff]   ;;  %v592_v33 = vld [vmem:[%s762_s0 + $0x4] ss:$16 sps:$4 sm:$0xff]   ;;  %v593_v34 = vld [vmem:[%s762_s0 + $0x8] ss:$16 sps:$4 sm:$0xff]  }
   0xe   :  { %536 = vmatprep.subr.bf16.mxu1 %v571_v13  ;;  %v595_v35 = vld [vmem:[%s762_s0 + $0xc] ss:$16 sps:$4 sm:$0xff]   ;;  %358 = vmatprep.mubr.bf16.mxu0 %v592_v33  ;;  %v596_v36 = vld [vmem:[%s762_s0 + $0x24] ss:$16 sps:$4 sm:$0xff]   ;;  %v600_v38 = vld [vmem:[%s762_s0 + $0x20] ss:$16 sps:$4 sm:$0xff]  }
   0xf   :  { %407 = vmatprep.mubr.bf16.mxu1 %v595_v35  ;;  %v598_v37 = vld [vmem:[%s762_s0 + $0x2c] ss:$16 sps:$4 sm:$0xff]   ;;  %v601_v39 = vld [vmem:[%s762_s0 + $0x28] ss:$16 sps:$4 sm:$0xff]  }
  0x10   :  { %509 = vmatpush3.bf16.msra.mxu0 %v572_v14 }
  0x11   :  { %537 = vmatpush3.bf16.msra.mxu1 %v573_v15  ;;  %510 = vmatprep.subr.bf16.mxu0 %v574_v16 }
  0x12   :  { %538 = vmatprep.subr.bf16.mxu1 %v575_v17 }
  0x14   :  { %511 = vmatpush3.bf16.msra.mxu0 %v576_v18 }
  0x15   :  { %539 = vmatpush3.bf16.msra.mxu1 %v577_v19  ;;  %512 = vmatprep.subr.bf16.mxu0 %v578_v20 }
  0x16   :  { %540 = vmatprep.subr.bf16.mxu1 %v579_v21 }
  0x18   :  { %513 = vmatpush3.bf16.msra.mxu0 %v580_v22 }
  0x19   :  { %541 = vmatpush3.bf16.msra.mxu1 %v581_v23  ;;  %514 = vmatprep.subr.bf16.mxu0 %v582_v24 }
  0x1a   :  { %542 = vmatprep.subr.bf16.mxu1 %v583_v25 }
  0x1c   :  { %515 = vmatpush3.bf16.msra.mxu0 %v584_v26 }
  0x1d   :  { %543 = vmatpush3.bf16.msra.mxu1 %v585_v27  ;;  %516 = vmatprep.subr.bf16.mxu0 %v586_v28 }
  0x1e   :  { %544 = vmatprep.subr.bf16.mxu1 %v587_v29 }
  0x20   :  { %517 = vmatpush3.bf16.msra.mxu0 %v588_v30 }
  0x21   :  { %545 = vmatpush3.bf16.msra.mxu1 %v589_v31 }
  0x23   :  { %359 = vmatmul.mubr.bf16.vlgmr.msra.gmra.mrb[0].mxu0 %v590_v32 }
  0x24   :  { %408 = vmatmul.mubr.bf16.vlgmr.msra.gmra.mrb[0].mxu1 %v593_v34  ;;  %366 = vmatprep.mubr.bf16.mxu0 %v596_v36 }
  0x25   :  { %415 = vmatprep.mubr.bf16.mxu1 %v598_v37 }
  0x2b   :  { %367 = vmatmul.mubr.bf16.gmra.mrb[4].mxu0 %v600_v38 }
  0x2c   :  { %416 = vmatmul.mubr.bf16.gmra.mrb[4].mxu1 %v601_v39 }
  0xf6   :  { %v518_v40 = vpop.f32.mrb[0].mxu0 }
  0xf7   :  { %v546_v41 = vpop.f32.mrb[0].mxu1  ;;  %v519_v43 = vpop.f32.mrb[1].mxu0 }
  0xf8   :  { %v520_v44 = vadd.f32 %v519_v43, %v518_v40  ;;  %v547_v45 = vpop.f32.mrb[1].mxu1  ;;  %v521_v46 = vpop.f32.mrb[2].mxu0 }
  0xf9   :  { %v548_v47 = vadd.f32 %v547_v45, %v546_v41  ;;  %v549_v48 = vpop.f32.mrb[2].mxu1  ;;  %v522_v49 = vpop.f32.mrb[3].mxu0 }
  0xfa   :  { %v361_v50 = vadd.f32 %v520_v44, %v453_v42  ;;  %v523_v51 = vadd.f32 %v522_v49, %v521_v46  ;;  %v550_v52 = vpop.f32.mrb[3].mxu1 }
  0xfb   :  { %v551_v53 = vadd.f32 %v550_v52, %v549_v48 }
  0xfc   :  { %v410_v54 = vadd.f32 %v548_v47, %v361_v50  ;;  %v364_v55 = vadd.f32 %v523_v51, %v453_v42 }
  0xfe   :  { %v424_v56 = vmax.f32 %v410_v54, 0.0  ;;  %v413_v57 = vadd.f32 %v551_v53, %v364_v55  ;;  %v524_v58 = vpop.f32.mrb[4].mxu0 }
  0xff   :  { %v552_v59 = vpop.f32.mrb[4].mxu1  ;;  %v525_v60 = vpop.f32.mrb[5].mxu0 }
 0x100   :  { %v498_v61 = vpack.c.bf16 %v424_v56, %v424_v56  ;;  %v425_v62 = vmax.f32 %v413_v57, 0.0  ;;  %v526_v63 = vadd.f32 %v525_v60, %v524_v58  ;;  %v553_v0 = vpop.f32.mrb[5].mxu1  ;;  %v527_v1 = vpop.f32.mrb[6].mxu0 }
 0x101   :  { %v554_v2 = vadd.f32 %v553_v0, %v552_v59  ;;  %v555_v3 = vpop.f32.mrb[6].mxu1  ;;  %v528_v4 = vpop.f32.mrb[7].mxu0 }
 0x102   :  { %445 = vst.msk [vmem:[%s764_s3] sm:$0xf] %vm444_vm0, %v498_v61  ;;  %v499_v5 = vpack.c.bf16 %v425_v62, %v425_v62  ;;  %v369_v6 = vadd.f32 %v526_v63, %v453_v42  ;;  %v529_v7 = vadd.f32 %v528_v4, %v527_v1  ;;  %v556_v8 = vpop.f32.mrb[7].mxu1 }
 0x103   :  { %v557_v9 = vadd.f32 %v556_v8, %v555_v3 }
 0x104   :  { %446 = vst.msk [vmem:[%s764_s3 + $0x4] sm:$0xf] %vm444_vm0, %v499_v5  ;;  %v418_v10 = vadd.f32 %v554_v2, %v369_v6  ;;  %v372_v11 = vadd.f32 %v529_v7, %v453_v42 }
 0x106   :  { %v426_v12 = vmax.f32 %v418_v10, 0.0  ;;  %v421_v13 = vadd.f32 %v557_v9, %v372_v11 }
 0x108   :  { %v500_v14 = vpack.c.bf16 %v426_v12, %v426_v12  ;;  %v427_v15 = vmax.f32 %v421_v13, 0.0 }
 0x10a   :  { %447 = vst.msk [vmem:[%s764_s3 + $0x8] sm:$0xf] %vm444_vm0, %v500_v14  ;;  %v501_v16 = vpack.c.bf16 %v427_v15, %v427_v15 }
 0x10c   :  { %448 = vst.msk [vmem:[%s764_s3 + $0xc] sm:$0xf] %vm444_vm0, %v501_v16 }

// kernel: actor_forward.5
= control target key start
LH: loop header
LB: loop body
LE: loop exit
PB: predicated region body
PF: predicated region fallthrough
CT: control target
= control target key end

     0   :  { %v1445_v0 = vmov 0.0   ;;  %s1489_s24 = smov 0   ;;  %s1752_s0 = inlined_call_operand.vmem [shape: bf16[4,16,576], index: 0, kind: input, shape index: {}]   ;;  %s1753_s1 = inlined_call_operand.vmem [shape: bf16[576,64], index: 1, kind: input, shape index: {}]   ;;  %s1754_s2 = inlined_call_operand.vmem [shape: f32[1,64], index: 2, kind: input, shape index: {}]   ;;  %s1755_s3 = inlined_call_operand.vmem [shape: bf16[4,64,512], index: 3, kind: input, shape index: {}]   ;;  %s1756_s4 = inlined_call_operand.vmem [shape: f32[1,512], index: 4, kind: input, shape index: {}]   ;;  %s1757_s5 = inlined_call_operand.vmem [shape: bf16[512,128], index: 5, kind: input, shape index: {}]   ;;  %s1758_s6 = inlined_call_operand.vmem [shape: f32[1,128], index: 6, kind: input, shape index: {}]   ;;  %s1759_s7 = inlined_call_operand.vmem [shape: f32[16,128], index: 7, kind: output, shape index: {}]  }
   0x1   :  { %27 = vst [vmem:[#allocation2] sm:$0xff] %v1445_v0  ;;  %28 = vst [vmem:[#allocation2 + $0x8] sm:$0xff] %v1445_v0 }
   0x2   :  { %29 = vst [vmem:[#allocation2 + $0x10] sm:$0xff] %v1445_v0  ;;  %30 = vst [vmem:[#allocation2 + $0x18] sm:$0xff] %v1445_v0 }
   0x3   :  { %31 = vst [vmem:[#allocation2 + $0x20] sm:$0xff] %v1445_v0  ;;  %32 = vst [vmem:[#allocation2 + $0x28] sm:$0xff] %v1445_v0 }
   0x4   :  { %33 = vst [vmem:[#allocation2 + $0x30] sm:$0xff] %v1445_v0  ;;  %34 = vst [vmem:[#allocation2 + $0x38] sm:$0xff] %v1445_v0 }
   0x5 LB: > { %v1338_v1 = vld [vmem:[%s1753_s1 + $0x40] sm:$0xff]   ;;  %v1342_v5 = vld [vmem:[%s1753_s1 + $0x48] sm:$0xff]   ;;  %v1346_v9 = vld [vmem:[%s1753_s1 + $0x50] sm:$0xff]   ;;  %s1219_s8 = smul.u32 40, %s1443_s24  ;;  %v1446_v34 = vmov 0.0   ;;  %s1220_s27 = sshll.u32 %s1443_s24, 7  ;;  %s1443_s24 = sphi %s1489_s24, %s40_s24  }
   0x6   : > { %v1339_v2 = vld [vmem:[%s1753_s1] sm:$0xff]   ;;  %1221 = vmatprep.subr.bf16.mxu0 %v1338_v1  ;;  %v1343_v6 = vld [vmem:[%s1753_s1 + $0x8] sm:$0xff]   ;;  %v1347_v10 = vld [vmem:[%s1753_s1 + $0x10] sm:$0xff]   ;;  %vm1447_vm0 = vmmov 0   ;;  %s1610_s11 = scalar_lea.vmem %s1755_s3, %s1220_s27  ;;  %vm370_vm1 = vcmask 523264   ;;  %v1448_v59 = vmov 0  }
   0x7   : > { %v1340_v3 = vld [vmem:[%s1753_s1 + $0xc0] sm:$0xff]   ;;  %1222 = vmatpush3.bf16.msra.mxu0 %v1339_v2  ;;  %v1344_v7 = vld [vmem:[%s1753_s1 + $0xc8] sm:$0xff]   ;;  %v1348_v11 = vld [vmem:[%s1753_s1 + $0xd0] sm:$0xff]   ;;  %s1585_s19 = scalar_lea.vmem %s1752_s0, %s1219_s8  ;;  %s40_s24 = sadd.s32 1, %s1443_s24  }
   0x8   : > { %v1341_v4 = vld [vmem:[%s1753_s1 + $0x80] sm:$0xff]   ;;  %1243 = vmatprep.subr.bf16.mxu1 %v1340_v3  ;;  %1223 = vmatprep.subr.bf16.mxu0 %v1342_v5  ;;  %v1345_v8 = vld [vmem:[%s1753_s1 + $0x88] sm:$0xff]   ;;  %v1349_v12 = vld [vmem:[%s1753_s1 + $0x90] sm:$0xff]   ;;  %p37_p0 = scmp.ge.s32.totalorder %s40_s24, 4  }
   0x9   : > { %1244 = vmatpush3.bf16.msra.mxu1 %v1341_v4  ;;  %v1350_v13 = vld [vmem:[%s1753_s1 + $0x58] sm:$0xff]   ;;  %v1354_v17 = vld [vmem:[%s1753_s1 + $0x60] sm:$0xff]   ;;  %v1358_v21 = vld [vmem:[%s1753_s1 + $0x68] sm:$0xff]  }
   0xa   : > { %1245 = vmatprep.subr.bf16.mxu1 %v1344_v7  ;;  %v1351_v14 = vld [vmem:[%s1753_s1 + $0x18] sm:$0xff]   ;;  %v1355_v18 = vld [vmem:[%s1753_s1 + $0x20] sm:$0xff]   ;;  %v1359_v22 = vld [vmem:[%s1753_s1 + $0x28] sm:$0xff]  }
   0xb   : > { %1224 = vmatpush3.bf16.msra.mxu0 %v1343_v6  ;;  %v1352_v15 = vld [vmem:[%s1753_s1 + $0xd8] sm:$0xff]   ;;  %v1356_v19 = vld [vmem:[%s1753_s1 + $0xe0] sm:$0xff]   ;;  %v1360_v23 = vld [vmem:[%s1753_s1 + $0xe8] sm:$0xff]  }
   0xc   : > { %1225 = vmatprep.subr.bf16.mxu0 %v1346_v9  ;;  %v1353_v16 = vld [vmem:[%s1753_s1 + $0x98] sm:$0xff]   ;;  %v1357_v20 = vld [vmem:[%s1753_s1 + $0xa0] sm:$0xff]   ;;  %v1361_v24 = vld [vmem:[%s1753_s1 + $0xa8] sm:$0xff]  }
   0xd   : > { %1246 = vmatpush3.bf16.msra.mxu1 %v1345_v8  ;;  %v1362_v25 = vld [vmem:[%s1753_s1 + $0x70] sm:$0xff]   ;;  %v1366_v29 = vld [vmem:[%s1753_s1 + $0x78] sm:$0xff]   ;;  %v1375_v37 = vld [vmem:[%s1585_s19 + $0xc] ss:$20 sps:$4 sm:$0xff]  }
   0xe   : > { %1247 = vmatprep.subr.bf16.mxu1 %v1348_v11  ;;  %v1363_v26 = vld [vmem:[%s1753_s1 + $0x30] sm:$0xff]   ;;  %v1367_v30 = vld [vmem:[%s1753_s1 + $0x38] sm:$0xff]   ;;  %v1376_v38 = vld [vmem:[%s1753_s1 + $0x100] sm:$0xff]   ;;  %447 = vmatprep.mubr.bf16.mxu1 %v1375_v37 }
   0xf   : > { %1226 = vmatpush3.bf16.msra.mxu0 %v1347_v10  ;;  %v1364_v27 = vld [vmem:[%s1753_s1 + $0xf0] sm:$0xff]   ;;  %v1368_v31 = vld [vmem:[%s1753_s1 + $0xf8] sm:$0xff]   ;;  %v1377_v39 = vld [vmem:[%s1753_s1 + $0x108] sm:$0xff]  }
  0x10   : > { %1227 = vmatprep.subr.bf16.mxu0 %v1350_v13  ;;  %v1365_v28 = vld [vmem:[%s1753_s1 + $0xb0] sm:$0xff]   ;;  %v1371_v33 = vld [vmem:[%s1585_s19 + $0x4] ss:$20 sps:$4 sm:$0xff]   ;;  %v1373_v36 = vld [vmem:[%s1585_s19 + $0x8] ss:$20 sps:$4 sm:$0xff]  }
  0x11   : > { %1248 = vmatpush3.bf16.msra.mxu1 %v1349_v12  ;;  %v1369_v32 = vld [vmem:[%s1585_s19] ss:$20 sps:$4 sm:$0xff]   ;;  %v1372_v35 = vld [vmem:[%s1753_s1 + $0xb8] sm:$0xff]   ;;  %406 = vmatprep.mubr.bf16.mxu0 %v1371_v33  ;;  %v1380_v42 = vld [vmem:[%s1585_s19 + $0x10] ss:$20 sps:$4 sm:$0xff]  }
  0x12   : > { %1249 = vmatprep.subr.bf16.mxu1 %v1352_v15  ;;  %v1378_v40 = vld [vmem:[%s1753_s1 + $0x110] sm:$0xff]   ;;  %v1379_v41 = vld [vmem:[%s1753_s1 + $0x118] sm:$0xff]   ;;  %v1123_v61 = vld [vmem:[%s1754_s2] ss:$0 sm:$0xff] }
  0x13   : > { %1228 = vmatpush3.bf16.msra.mxu0 %v1351_v14  ;;  %v1381_v43 = vld [vmem:[%s1610_s11] ss:$16 sps:$4 sm:$0xff]   ;;  %v1383_v44 = vld [vmem:[%s1610_s11 + $0x4] ss:$16 sps:$4 sm:$0xff]   ;;  %v1384_v45 = vld [vmem:[%s1610_s11 + $0x8] ss:$16 sps:$4 sm:$0xff]  }
  0x14   : > { %1229 = vmatprep.subr.bf16.mxu0 %v1354_v17  ;;  %v1386_v46 = vld [vmem:[%s1610_s11 + $0xc] ss:$16 sps:$4 sm:$0xff]   ;;  %v1389_v47 = vld [vmem:[%s1610_s11 + $0x24] ss:$16 sps:$4 sm:$0xff]   ;;  %v1387_v49 = vld [vmem:[%s1610_s11 + $0x20] ss:$16 sps:$4 sm:$0xff]  }
  0x15   : > { %1250 = vmatpush3.bf16.msra.mxu1 %v1353_v16  ;;  %v1392_v48 = vld [vmem:[%s1610_s11 + $0x2c] ss:$16 sps:$4 sm:$0xff]   ;;  %v1390_v50 = vld [vmem:[%s1610_s11 + $0x28] ss:$16 sps:$4 sm:$0xff]   ;;  %v1395_v51 = vld [vmem:[%s1610_s11 + $0x44] ss:$16 sps:$4 sm:$0xff]  }
  0x16   : > { %1251 = vmatprep.subr.bf16.mxu1 %v1356_v19  ;;  %v1398_v52 = vld [vmem:[%s1610_s11 + $0x4c] ss:$16 sps:$4 sm:$0xff]   ;;  %v1393_v53 = vld [vmem:[%s1610_s11 + $0x40] ss:$16 sps:$4 sm:$0xff]   ;;  %v1396_v54 = vld [vmem:[%s1610_s11 + $0x48] ss:$16 sps:$4 sm:$0xff]  }
  0x17   : > { %1230 = vmatpush3.bf16.msra.mxu0 %v1355_v18  ;;  %v1401_v55 = vld [vmem:[%s1610_s11 + $0x64] ss:$16 sps:$4 sm:$0xff]   ;;  %v1404_v56 = vld [vmem:[%s1610_s11 + $0x6c] ss:$16 sps:$4 sm:$0xff]   ;;  %v1399_v57 = vld [vmem:[%s1610_s11 + $0x60] ss:$16 sps:$4 sm:$0xff]  }
  0x18   : > { %1231 = vmatprep.subr.bf16.mxu0 %v1358_v21  ;;  %v1402_v58 = vld [vmem:[%s1610_s11 + $0x68] ss:$16 sps:$4 sm:$0xff]  }
  0x19   : > { %1252 = vmatpush3.bf16.msra.mxu1 %v1357_v20 }
  0x1a   : > { %1253 = vmatprep.subr.bf16.mxu1 %v1360_v23  ;;  %v502_v23 = vld [vmem:[#allocation2 + $0x10] sm:$0xff] }
  0x1b   : > { %1232 = vmatpush3.bf16.msra.mxu0 %v1359_v22  ;;  %v500_v22 = vld [vmem:[#allocation2] sm:$0xff] }
  0x1c   : > { %1233 = vmatprep.subr.bf16.mxu0 %v1362_v25  ;;  %v503_v25 = vld [vmem:[#allocation2 + $0x18] sm:$0xff] }
  0x1d   : > { %1254 = vmatpush3.bf16.msra.mxu1 %v1361_v24  ;;  %v501_v24 = vld [vmem:[#allocation2 + $0x8] sm:$0xff] }
  0x1e   : > { %1255 = vmatprep.subr.bf16.mxu1 %v1364_v27 }
  0x1f   : > { %1234 = vmatpush3.bf16.msra.mxu0 %v1363_v26 }
  0x20   : > { %1235 = vmatprep.subr.bf16.mxu0 %v1366_v29  ;;  %v506_v29 = vld [vmem:[#allocation2 + $0x30] sm:$0xff] }
  0x21   : > { %1256 = vmatpush3.bf16.msra.mxu1 %v1365_v28  ;;  %v504_v28 = vld [vmem:[#allocation2 + $0x20] sm:$0xff] }
  0x22   : > { %1257 = vmatprep.subr.bf16.mxu1 %v1368_v31 }
  0x23   : > { %1236 = vmatpush3.bf16.msra.mxu0 %v1367_v30 }
  0x24   : > { %1314 = vmatprep.subr.bf16.mxu0 %v1446_v34 }
  0x25   : > { %1258 = vmatpush3.bf16.msra.mxu1 %v1372_v35  ;;  %v507_v35 = vld [vmem:[#allocation2 + $0x38] sm:$0xff] }
  0x26   : > { %407 = vmatmul.mubr.bf16.vlgmr.msra.gmra.mrb[0].mxu0 %v1369_v32  ;;  %610 = vmatprep.subr.bf16.mxu1 %v1383_v44 }
  0x27   : > { %1322 = vmatprep.mubr.msk.bf16.mxu0 %vm1447_vm0, %v1446_v34  ;;  %1315 = vmatpush3.bf16.msra.mxu0 %v1376_v38 }
  0x28   : > { %448 = vmatmul.mubr.bf16.vlgmr.msra.gmra.mrb[0].mxu1 %v1373_v36  ;;  %1316 = vmatprep.subr.bf16.mxu0 %v1446_v34 }
  0x29   : > { %611 = vmatpush1.bf16.msra.mxu1 %v1381_v43  ;;  %642 = vmatprep.mubr.bf16.mxu1 %v1448_v59 }
  0x2a   : > { %612 = vmatprep.subr.bf16.mxu1 %v1389_v47  ;;  %v1406_v47 = vld [vmem:[%s1757_s5 + $0xc0] sm:$0xff] (%p37_p0)  }
  0x2b   : > { %1317 = vmatpush3.bf16.msra.mxu0 %v1377_v39 }
  0x2c   : > { %1318 = vmatprep.subr.bf16.mxu0 %v1446_v34 }
  0x2d   : > { %613 = vmatpush1.bf16.msra.mxu1 %v1387_v49  ;;  %v1408_v49 = vld [vmem:[%s1757_s5 + $0x80] sm:$0xff] (%p37_p0)  }
  0x2e   : > { %614 = vmatprep.subr.bf16.mxu1 %v1395_v51  ;;  %v1410_v51 = vld [vmem:[%s1757_s5 + $0xc8] sm:$0xff] (%p37_p0)  }
  0x2f   : > { %1319 = vmatpush3.bf16.msra.mxu0 %v1378_v40 }
  0x30   : > { %1320 = vmatprep.subr.bf16.mxu0 %v1446_v34  ;;  %v505_v34 = vld [vmem:[#allocation2 + $0x28] sm:$0xff] }
  0x31   : > { %615 = vmatpush1.bf16.msra.mxu1 %v1393_v53  ;;  %v1412_v53 = vld [vmem:[%s1757_s5 + $0x88] sm:$0xff] (%p37_p0)  }
  0x32   : > { %616 = vmatprep.subr.bf16.mxu1 %v1401_v55  ;;  %v1414_v55 = vld [vmem:[%s1757_s5 + $0xd0] sm:$0xff] (%p37_p0)  }
  0x33   : > { %1321 = vmatpush3.bf16.msra.mxu0 %v1379_v41 }
  0x34   : > { %653 = vmatprep.subr.bf16.mxu0 %v1386_v46  ;;  %v1405_v46 = vld [vmem:[%s1757_s5 + $0x40] sm:$0xff] (%p37_p0)  }
  0x35   : > { %617 = vmatpush1.bf16.msra.mxu1 %v1399_v57  ;;  %v1416_v57 = vld [vmem:[%s1757_s5 + $0x90] sm:$0xff] (%p37_p0)  }
  0x36   : > { %1323 = vmatmul.mubr.msk.bf16.vlgmr.msra.gmra.mrb[4].mxu0 %vm370_vm1, %v1380_v42  ;;  %1292 = vmatprep.subr.bf16.mxu1 (%p37_p0), %v1406_v47 }
  0x37   : > { %654 = vmatpush1.bf16.msra.mxu0 %v1384_v45  ;;  %685 = vmatprep.mubr.bf16.mxu0 %v1448_v59  ;;  %v1418_v59 = vld [vmem:[%s1757_s5 + $0xd8] sm:$0xff] (%p37_p0)  }
  0x38   : > { %655 = vmatprep.subr.bf16.mxu0 %v1392_v48  ;;  %v1407_v48 = vld [vmem:[%s1757_s5] sm:$0xff] (%p37_p0)  }
  0x3b   : > { %656 = vmatpush1.bf16.msra.mxu0 %v1390_v50  ;;  %v1409_v50 = vld [vmem:[%s1757_s5 + $0x48] sm:$0xff] (%p37_p0)  }
  0x3c   : > { %657 = vmatprep.subr.bf16.mxu0 %v1398_v52  ;;  %v1411_v52 = vld [vmem:[%s1757_s5 + $0x8] sm:$0xff] (%p37_p0)  }
  0x3f   : > { %658 = vmatpush1.bf16.msra.mxu0 %v1396_v54  ;;  %v1413_v54 = vld [vmem:[%s1757_s5 + $0x50] sm:$0xff] (%p37_p0)  }
  0x40   : > { %659 = vmatprep.subr.bf16.mxu0 %v1404_v56  ;;  %v1415_v56 = vld [vmem:[%s1757_s5 + $0x10] sm:$0xff] (%p37_p0)  }
  0x43   : > { %660 = vmatpush1.bf16.msra.mxu0 %v1402_v58  ;;  %v1417_v58 = vld [vmem:[%s1757_s5 + $0x58] sm:$0xff] (%p37_p0)  }
  0x44   :  { %1270 = vmatprep.subr.bf16.mxu0 (%p37_p0), %v1405_v46 }
  0xf9   : > { %v1237_v60 = vpop.f32.mrb[0].mxu0 }
  0xfa   : > { %v1238_v62 = vpop.f32.mrb[1].mxu0 }
  0xfb   : > { %v1239_v63 = vadd.f32 %v1238_v62, %v1237_v60  ;;  %v1240_v0 = vpop.f32.mrb[2].mxu0  ;;  %v1259_v1 = vpop.f32.mrb[0].mxu1  ;;  %v1419_v60 = vld [vmem:[%s1757_s5 + $0x18] sm:$0xff] (%p37_p0)   ;;  %v1421_v62 = vld [vmem:[%s1757_s5 + $0x60] sm:$0xff] (%p37_p0)  }
  0xfc   : > { %v1241_v2 = vpop.f32.mrb[3].mxu0  ;;  %v1260_v5 = vpop.f32.mrb[1].mxu1 }
  0xfd   : > { %v409_v3 = vadd.f32 %v1239_v63, %v1123_v61  ;;  %v1242_v4 = vadd.f32 %v1241_v2, %v1240_v0  ;;  %v1261_v6 = vadd.f32 %v1260_v5, %v1259_v1  ;;  %v1262_v7 = vpop.f32.mrb[2].mxu1  ;;  %v1422_v63 = vld [vmem:[%s1757_s5 + $0xe0] sm:$0xff] (%p37_p0)   ;;  %v722_v1 = vlaneseq (%p37_p0)  ;;  %v1427_v5 = vld [vmem:[%s1757_s5 + $0x28] sm:$0xff] (%p37_p0)  }
  0xfe   : > { %v1263_v9 = vpop.f32.mrb[3].mxu1  ;;  %v1423_v0 = vld [vmem:[%s1757_s5 + $0x20] sm:$0xff] (%p37_p0)  }
  0xff   : > { %v412_v8 = vadd.f32 %v1242_v4, %v1123_v61  ;;  %v1264_v10 = vadd.f32 %v1263_v9, %v1262_v7  ;;  %v450_v11 = vadd.f32 %v1261_v6, %v409_v3  ;;  %v1420_v61 = vld [vmem:[%s1757_s5 + $0x98] sm:$0xff] (%p37_p0)   ;;  %v1424_v2 = vld [vmem:[%s1757_s5 + $0xa0] sm:$0xff] (%p37_p0)   ;;  %v1425_v3 = vld [vmem:[%s1757_s5 + $0x68] sm:$0xff] (%p37_p0)   ;;  %v723_v6 = vshrl.u32 (%p37_p0), %v722_v1, 7 }
 0x100   :  { %v1426_v4 = vld [vmem:[%s1757_s5 + $0xe8] sm:$0xff] (%p37_p0)   ;;  %v1430_v9 = vld [vmem:[%s1757_s5 + $0xf0] sm:$0xff] (%p37_p0)  }
 0x101   : > { %v453_v12 = vadd.f32 %v1264_v10, %v412_v8  ;;  %v1428_v7 = vld [vmem:[%s1757_s5 + $0xa8] sm:$0xff] (%p37_p0)   ;;  %v1429_v8 = vld [vmem:[%s1757_s5 + $0x70] sm:$0xff] (%p37_p0)  }
 0x102   :  { %v1431_v10 = vld [vmem:[%s1757_s5 + $0x30] sm:$0xff] (%p37_p0)  }
 0x109   : > { %v490_v13 = vpop.f32.mrb[4].mxu0 }
 0x10a   : > { %v491_v14 = vadd.f32 %v490_v13, %v450_v11  ;;  %v1324_v15 = vpop.f32.mrb[5].mxu0  ;;  %v728_v11 = vsub.s32 (%p37_p0), 1, %v723_v6  ;;  %v736_v13 = vsub.s32 (%p37_p0), 3, %v723_v6 }
 0x10b   : > { %v493_v16 = vpop.f32.mrb[6].mxu0  ;;  %v724_v15 = vsub.s32 (%p37_p0), 0, %v723_v6 }
 0x10c   : > { %v494_v17 = vadd.f32 %v493_v16, %v453_v12  ;;  %v1325_v18 = vpop.f32.mrb[7].mxu0  ;;  %v497_v19 = vmax.f32 %v491_v14, 0.0  ;;  %v1432_v12 = vld [vmem:[%s1757_s5 + $0xb0] sm:$0xff] (%p37_p0)   ;;  %v1433_v14 = vld [vmem:[%s1757_s5 + $0x78] sm:$0xff] (%p37_p0)  }
 0x10d   :  { %v1434_v16 = vld [vmem:[%s1757_s5 + $0xf8] sm:$0xff] (%p37_p0)  }
 0x10e   : > { %v498_v20 = vmax.f32 %v494_v17, 0.0  ;;  %v732_v17 = vsub.s32 (%p37_p0), 2, %v723_v6  ;;  %v1435_v18 = vld [vmem:[%s1757_s5 + $0x38] sm:$0xff] (%p37_p0)  }
 0x110   : > { %v499_v21 = vpack.c.bf16 %v498_v20, %v497_v19  ;;  %v1436_v19 = vld [vmem:[%s1757_s5 + $0xb8] sm:$0xff] (%p37_p0)  }
 0x112   : > { %1184 = vmatmul.mubr.msk.bf16.vlgmr.msra.gmra.mrb[4].mxu1 %vm370_vm1, %v499_v21  ;;  %1185 = vmatmul.mubr.msk.bf16.vlgmr.msra.gmra.mrb[8].mxu0 %vm370_vm1, %v499_v21 }
 0x113   :  { %1271 = vmatpush3.bf16.msra.mxu0 (%p37_p0), %v1407_v48  ;;  %1293 = vmatpush3.bf16.msra.mxu1 (%p37_p0), %v1408_v49 }
 0x114   :  { %1272 = vmatprep.subr.bf16.mxu0 (%p37_p0), %v1409_v50  ;;  %1294 = vmatprep.subr.bf16.mxu1 (%p37_p0), %v1410_v51 }
 0x117   :  { %1273 = vmatpush3.bf16.msra.mxu0 (%p37_p0), %v1411_v52  ;;  %1295 = vmatpush3.bf16.msra.mxu1 (%p37_p0), %v1412_v53 }
 0x118   :  { %1274 = vmatprep.subr.bf16.mxu0 (%p37_p0), %v1413_v54  ;;  %1296 = vmatprep.subr.bf16.mxu1 (%p37_p0), %v1414_v55  ;;  %v1186_v55 = vld [vmem:[%s1758_s6] ss:$0 sm:$0xff] (%p37_p0) }
 0x11b   :  { %1275 = vmatpush3.bf16.msra.mxu0 (%p37_p0), %v1415_v56  ;;  %1297 = vmatpush3.bf16.msra.mxu1 (%p37_p0), %v1416_v57 }
 0x11c   :  { %1276 = vmatprep.subr.bf16.mxu0 (%p37_p0), %v1417_v58  ;;  %1298 = vmatprep.subr.bf16.mxu1 (%p37_p0), %v1418_v59 }
 0x11f   :  { %1277 = vmatpush3.bf16.msra.mxu0 (%p37_p0), %v1419_v60  ;;  %1299 = vmatpush3.bf16.msra.mxu1 (%p37_p0), %v1420_v61 }
 0x120   :  { %1278 = vmatprep.subr.bf16.mxu0 (%p37_p0), %v1421_v62  ;;  %1300 = vmatprep.subr.bf16.mxu1 (%p37_p0), %v1422_v63 }
 0x123   :  { %1279 = vmatpush3.bf16.msra.mxu0 (%p37_p0), %v1423_v0  ;;  %1301 = vmatpush3.bf16.msra.mxu1 (%p37_p0), %v1424_v2 }
 0x124   :  { %1280 = vmatprep.subr.bf16.mxu0 (%p37_p0), %v1425_v3  ;;  %1302 = vmatprep.subr.bf16.mxu1 (%p37_p0), %v1426_v4 }
 0x127   :  { %1281 = vmatpush3.bf16.msra.mxu0 (%p37_p0), %v1427_v5  ;;  %1303 = vmatpush3.bf16.msra.mxu1 (%p37_p0), %v1428_v7 }
 0x128   :  { %1282 = vmatprep.subr.bf16.mxu0 (%p37_p0), %v1429_v8  ;;  %1304 = vmatprep.subr.bf16.mxu1 (%p37_p0), %v1430_v9 }
 0x12b   :  { %1283 = vmatpush3.bf16.msra.mxu0 (%p37_p0), %v1431_v10  ;;  %1305 = vmatpush3.bf16.msra.mxu1 (%p37_p0), %v1432_v12 }
 0x12c   :  { %1284 = vmatprep.subr.bf16.mxu0 (%p37_p0), %v1433_v14  ;;  %1306 = vmatprep.subr.bf16.mxu1 (%p37_p0), %v1434_v16 }
 0x12f   :  { %1285 = vmatpush3.bf16.msra.mxu0 (%p37_p0), %v1435_v18  ;;  %1307 = vmatpush3.bf16.msra.mxu1 (%p37_p0), %v1436_v19 }
 0x1e5   : > { %v644_v26 = vpop.f32.mrb[4].mxu1  ;;  %v687_v27 = vpop.f32.mrb[8].mxu0  ;;  %39 = sbr.rel (!%p37_p0) target bundleno = 5 (0x5), region = 57 }
 0x1e6   : > { %v696_v30 = vadd.f32 %v644_v26, %v500_v22  ;;  %v698_v31 = vadd.f32 %v687_v27, %v502_v23  ;;  %v646_v32 = vpop.f32.mrb[5].mxu1  ;;  %v689_v33 = vpop.f32.mrb[9].mxu0  ;;  %v720_v22 = vld [vmem:[%s1756_s4] sm:$0xf] (%p37_p0) }
 0x1e7   : > { %v697_v36 = vadd.f32 %v646_v32, %v501_v24  ;;  %v699_v37 = vadd.f32 %v689_v33, %v503_v25  ;;  %v648_v38 = vpop.f32.mrb[6].mxu1  ;;  %v691_v39 = vpop.f32.mrb[10].mxu0  ;;  %v729_v23 = vrot.slane (%p37_p0), %v720_v22, %v728_v11  ;;  %v737_v26 = vrot.slane (%p37_p0), %v720_v22, %v736_v13 }
 0x1e8   : > { %704 = vst [vmem:[#allocation2] sm:$0xff] %v696_v30  ;;  %706 = vst [vmem:[#allocation2 + $0x10] sm:$0xff] %v698_v31  ;;  %v700_v40 = vadd.f32 %v648_v38, %v504_v28  ;;  %v702_v41 = vadd.f32 %v691_v39, %v506_v29  ;;  %v650_v42 = vpop.f32.mrb[7].mxu1  ;;  %v693_v43 = vpop.f32.mrb[11].mxu0  ;;  %v725_v28 = vrot.slane (%p37_p0), %v720_v22, %v724_v15 }
 0x1e9   : > { %705 = vst [vmem:[#allocation2 + $0x8] sm:$0xff] %v697_v36  ;;  %707 = vst [vmem:[#allocation2 + $0x18] sm:$0xff] %v699_v37  ;;  %v701_v44 = vadd.f32 %v650_v42, %v505_v34  ;;  %v703_v45 = vadd.f32 %v693_v43, %v507_v35  ;;  %v733_v29 = vrot.slane (%p37_p0), %v720_v22, %v732_v17 }
 0x1ea   : > { %708 = vst [vmem:[#allocation2 + $0x20] sm:$0xff] %v700_v40  ;;  %710 = vst [vmem:[#allocation2 + $0x30] sm:$0xff] %v702_v41 }
 0x1eb   : > { %709 = vst [vmem:[#allocation2 + $0x28] sm:$0xff] %v701_v44  ;;  %711 = vst [vmem:[#allocation2 + $0x38] sm:$0xff] %v703_v45 }
 0x1ef   :  { %v712_v27 = vld [vmem:[#allocation2] sm:$0xff]  ;;  %v714_v31 = vld [vmem:[#allocation2 + $0x10] sm:$0xff] }
 0x1f0   :  { %v713_v20 = vld [vmem:[#allocation2 + $0x8] sm:$0xff]  ;;  %v715_v24 = vld [vmem:[#allocation2 + $0x18] sm:$0xff]  ;;  %v742_v37 = vadd.f32 %v725_v28, %v712_v27  ;;  %v744_v39 = vadd.f32 %v733_v29, %v714_v31 }
 0x1f1   :  { %v716_v30 = vld [vmem:[#allocation2 + $0x20] sm:$0xff]  ;;  %v718_v32 = vld [vmem:[#allocation2 + $0x30] sm:$0xff]  ;;  %v743_v33 = vadd.f32 %v729_v23, %v713_v20  ;;  %v745_v35 = vadd.f32 %v737_v26, %v715_v24 }
 0x1f2   :  { %v717_v21 = vld [vmem:[#allocation2 + $0x28] sm:$0xff]  ;;  %v719_v25 = vld [vmem:[#allocation2 + $0x38] sm:$0xff]  ;;  %v746_v38 = vadd.f32 %v725_v28, %v716_v30  ;;  %v748_v40 = vadd.f32 %v733_v29, %v718_v32  ;;  %v750_v45 = vmax.f32 %v742_v37, 0.0  ;;  %v752_v47 = vmax.f32 %v744_v39, 0.0 }
 0x1f3   :  { %v747_v34 = vadd.f32 %v729_v23, %v717_v21  ;;  %v749_v36 = vadd.f32 %v737_v26, %v719_v25  ;;  %v751_v41 = vmax.f32 %v743_v33, 0.0  ;;  %v753_v43 = vmax.f32 %v745_v35, 0.0 }
 0x1f4   :  { %v754_v46 = vmax.f32 %v746_v38, 0.0  ;;  %v756_v48 = vmax.f32 %v748_v40, 0.0 }
 0x1f5   :  { %v755_v42 = vmax.f32 %v747_v34, 0.0  ;;  %v757_v44 = vmax.f32 %v749_v36, 0.0 }
 0x1f6   :  { %v758_v51 = vpack.c.bf16 %v754_v46, %v750_v45  ;;  %v760_v52 = vpack.c.bf16 %v756_v48, %v752_v47 }
 0x1f7   :  { %v759_v49 = vpack.c.bf16 %v755_v42, %v751_v41  ;;  %v761_v50 = vpack.c.bf16 %v757_v44, %v753_v43 }
 0x1f9   :  { %1057 = vmatprep.mubr.bf16.mxu0 %v759_v49  ;;  %1098 = vmatprep.mubr.bf16.mxu1 %v761_v50 }
 0x1fa   :  { %1058 = vmatmul.mubr.bf16.vlgmr.msra.gmra.mrb[0].mxu0 %v758_v51  ;;  %1099 = vmatmul.mubr.bf16.vlgmr.msra.gmra.mrb[0].mxu1 %v760_v52 }
 0x2cd   :  { %v1286_v53 = vpop.f32.mrb[0].mxu0  ;;  %v1308_v54 = vpop.f32.mrb[0].mxu1 }
 0x2ce   :  { %v1287_v56 = vpop.f32.mrb[1].mxu0  ;;  %v1309_v57 = vpop.f32.mrb[1].mxu1 }
 0x2cf   :  { %v1288_v58 = vadd.f32 %v1287_v56, %v1286_v53  ;;  %v1310_v59 = vadd.f32 %v1309_v57, %v1308_v54  ;;  %v1289_v60 = vpop.f32.mrb[2].mxu0  ;;  %v1311_v61 = vpop.f32.mrb[2].mxu1 }
 0x2d0   :  { %v1290_v62 = vpop.f32.mrb[3].mxu0  ;;  %v1312_v63 = vpop.f32.mrb[3].mxu1 }
 0x2d1   :  { %v1060_v0 = vadd.f32 %v1288_v58, %v1186_v55  ;;  %v1291_v1 = vadd.f32 %v1290_v62, %v1289_v60  ;;  %v1313_v2 = vadd.f32 %v1312_v63, %v1311_v61 }
 0x2d3   :  { %v1101_v3 = vadd.f32 %v1310_v59, %v1060_v0  ;;  %v1063_v4 = vadd.f32 %v1291_v1, %v1186_v55 }
 0x2d5   :  { %1107 = vst [vmem:[%s1759_s7] sm:$0xff] %v1101_v3  ;;  %v1104_v5 = vadd.f32 %v1313_v2, %v1063_v4 }
 0x2d7   :  { %1108 = vst [vmem:[%s1759_s7 + $0x8] sm:$0xff] %v1104_v5 }

</bundles_post_ra>
